<compile_context>
chip_gen: v7x
topology: tpu7x:2x2x1
jax: 0.10.0
libtpu: 0.0.40
codegen_flags: <defaults>
</compile_context>

<pallas_src>
import functools

import jax
import jax.numpy as jnp
from jax.experimental import pallas as pl
from jax.experimental.pallas import tpu as pltpu


# --------------------------------------------------------------------------
# Fused kernel (one grid step == one image, fully resident in VMEM)
# --------------------------------------------------------------------------
def _bottleneck_kernel(x_ref, w1_ref, b1_ref, w2_ref, b2_ref, w3_ref, b3_ref,
                       o_ref, ycat_ref, *, H, W, lead, compute_dtype):
    HW = H * W
    cm = w1_ref.shape[1]
    pad_rows, cat_w = ycat_ref.shape

    xm = x_ref[0]                                     # (HW, C_in), caller dtype

    # ---- conv1 (1x1, BN scale folded into w1) + bias + relu ----------------
    y1 = jnp.dot(xm.astype(compute_dtype), w1_ref[...],
                 preferred_element_type=jnp.float32)
    y1 = jnp.maximum(y1 + b1_ref[...], 0.0)
    y1c = y1.astype(compute_dtype)                    # cast once for staging

    # Column masks generated in-kernel (no lane-padded HBM mask inputs).
    col = jax.lax.broadcasted_iota(jnp.int32, (HW, 1), 0) % W
    not_first = (col != 0).astype(compute_dtype)      # kills j == 0
    not_last = (col != W - 1).astype(compute_dtype)   # kills j == W-1

    # ---- stage conv2 LHS: zero only the (small) border rows, then write ----
    # the three column taps (dw=-1,0,+1) side-by-side along lanes so conv2
    # becomes 3 matmuls with K = 3*c_mid.
    ycat_ref[0:lead + 1, :] = jnp.zeros((lead + 1, cat_w), compute_dtype)
    ycat_ref[lead + HW - 1:, :] = jnp.zeros((pad_rows - (lead + HW - 1), cat_w),
                                            compute_dtype)
    ycat_ref[lead + 1:lead + 1 + HW, 0:cm] = y1c * not_last         # dw = -1
    ycat_ref[lead:lead + HW, cm:2 * cm] = y1c                       # dw =  0
    ycat_ref[lead - 1:lead - 1 + HW, 2 * cm:3 * cm] = y1c * not_first  # dw = +1

    # ---- conv2 (3x3, stride 1, pad 1, BN scale folded) ---------------------
    # Three row-shifted (dh=-1,0,+1), sublane-aligned LHS slices, K = 3*c_mid.
    acc = jnp.dot(ycat_ref[lead - W:lead - W + HW, :], w2_ref[0],
                  preferred_element_type=jnp.float32)
    acc = acc + jnp.dot(ycat_ref[lead:lead + HW, :], w2_ref[1],
                        preferred_element_type=jnp.float32)
    acc = acc + jnp.dot(ycat_ref[lead + W:lead + W + HW, :], w2_ref[2],
                        preferred_element_type=jnp.float32)
    y2 = jnp.maximum(acc + b2_ref[...], 0.0)

    # ---- conv3 (1x1, BN scale folded) + bias + identity residual + relu ----
    y3 = jnp.dot(y2.astype(compute_dtype), w3_ref[...],
                 preferred_element_type=jnp.float32)
    y3 = y3 + b3_ref[...] + xm.astype(jnp.float32)    # residual kept in f32
    o_ref[0] = jnp.maximum(y3, 0.0).astype(o_ref.dtype)


# --------------------------------------------------------------------------
# One-time parameter preparation (hoisted out of the forward path)
# --------------------------------------------------------------------------
def _fold_bn(gamma, beta, mean, var, eps):
    scale = (gamma / jnp.sqrt(var + eps)).astype(jnp.float32)
    bias = (beta - mean * scale).astype(jnp.float32)
    return scale, bias


def prepare_params(raw, *, eps=1e-5, compute_dtype=jnp.float32):
    """Fold eval-mode BatchNorm scale into the conv weights (in f32, before any
    bf16 cast) and lay the weights out for channel matmuls.

    `raw` uses PyTorch layouts: conv1_w (C_mid, C_in, 1, 1),
    conv2_w (C_mid, C_mid, 3, 3), conv3_w (C_out, C_mid, 1, 1), bn{1,2,3}_{g,b,m,v}.
    """
    c_mid = raw["conv1_w"].shape[0]
    s1, b1 = _fold_bn(raw["bn1_g"], raw["bn1_b"], raw["bn1_m"], raw["bn1_v"], eps)
    s2, b2 = _fold_bn(raw["bn2_g"], raw["bn2_b"], raw["bn2_m"], raw["bn2_v"], eps)
    s3, b3 = _fold_bn(raw["bn3_g"], raw["bn3_b"], raw["bn3_m"], raw["bn3_v"], eps)

    w1 = jnp.transpose(raw["conv1_w"][:, :, 0, 0], (1, 0)).astype(jnp.float32)
    w1 = w1 * s1[None, :]                                    # (C_in, C_mid)

    w2 = jnp.transpose(raw["conv2_w"], (2, 3, 1, 0)).astype(jnp.float32)
    w2 = w2 * s2[None, None, None, :]                        # (kh, kw, C_in, C_out)
    w2 = w2.reshape(3, 3 * c_mid, c_mid)                     # kw-major along K

    w3 = jnp.transpose(raw["conv3_w"][:, :, 0, 0], (1, 0)).astype(jnp.float32)
    w3 = w3 * s3[None, :]                                    # (C_mid, C_out)

    return dict(w1=w1.astype(compute_dtype), b1=b1[None, :],
                w2=w2.astype(compute_dtype), b2=b2[None, :],
                w3=w3.astype(compute_dtype), b3=b3[None, :])


# --------------------------------------------------------------------------
# Forward wrappers
# --------------------------------------------------------------------------
def bottleneck_forward_nhwc(x_nhwc, prep, stride=1):
    """Fused bottleneck forward on NHWC input (no layout transposes)."""
    if stride != 1:
        # TODO(synk): stride>1 requires a downsample conv on the identity path.
        raise NotImplementedError("fused kernel covers the downsample=None / stride=1 path")
    n, h, w, c_in = x_nhwc.shape
    c_mid = prep["w1"].shape[1]
    c_out = prep["w3"].shape[1]
    if c_in != c_out:
        raise ValueError(
            f"identity residual requires in_channel == out_channel*expansion "
            f"(got C_in={c_in}, C_out={c_out})")

    cdt = prep["w1"].dtype
    hw = h * w
    lead = ((w + 1 + 7) // 8) * 8          # round_up(W+1, 8): sublane-aligned taps
    pad_rows = lead + hw + lead            # zero border above/below the image

    x2 = x_nhwc.reshape(n, hw, c_in)       # keep caller dtype (f32 residual path)

    kernel = functools.partial(_bottleneck_kernel, H=h, W=w, lead=lead,
                               compute_dtype=cdt)
    const2 = lambda i: (0, 0)              # VMEM-resident across grid steps

    grid_spec = pltpu.PrefetchScalarGridSpec(
        num_scalar_prefetch=0,
        grid=(n,),
        in_specs=[
            pl.BlockSpec((1, hw, c_in), lambda i: (i, 0, 0)),       # x (per image)
            pl.BlockSpec((c_in, c_mid), const2),                    # w1 (scale folded)
            pl.BlockSpec((1, c_mid), const2),                       # b1
            pl.BlockSpec((3, 3 * c_mid, c_mid), lambda i: (0, 0, 0)),  # w2 (scale folded)
            pl.BlockSpec((1, c_mid), const2),                       # b2
            pl.BlockSpec((c_mid, c_out), const2),                   # w3 (scale folded)
            pl.BlockSpec((1, c_out), const2),                       # b3
        ],
        out_specs=pl.BlockSpec((1, hw, c_out), lambda i: (i, 0, 0)),
        scratch_shapes=[pltpu.VMEM((pad_rows, 3 * c_mid), cdt)],    # conv2 LHS staging
    )

    out = pl.pallas_call(
        kernel,
        out_shape=jax.ShapeDtypeStruct((n, hw, c_out), x_nhwc.dtype),
        grid_spec=grid_spec,
        compiler_params=pltpu.CompilerParams(
            dimension_semantics=("parallel",),     # megacore-shard the batch on v7x
            vmem_limit_bytes=32 * 1024 * 1024,     # safe on v5e/v6e/v7x
        ),
    )(x2,
      prep["w1"], prep["b1"],
      prep["w2"], prep["b2"],
      prep["w3"], prep["b3"])
    return out.reshape(n, h, w, c_out)


@functools.partial(jax.jit, static_argnames=("stride",))
def bottleneck_forward(x_nchw, prep, stride=1):
    """PyTorch-convention (NCHW) wrapper around the fused NHWC kernel."""
    x = jnp.transpose(x_nchw, (0, 2, 3, 1))
    y = bottleneck_forward_nhwc(x, prep, stride=stride)
    return jnp.transpose(y, (0, 3, 1, 2))


# --------------------------------------------------------------------------
# Pure-JAX reference (lax convs, eval-mode BN) for verification
# --------------------------------------------------------------------------
def bottleneck_reference(x_nchw, raw, stride=1, eps=1e-5):
    x = jnp.transpose(x_nchw, (0, 2, 3, 1))

    def conv(v, w_oihw, s, pad):
        w_hwio = jnp.transpose(w_oihw, (2, 3, 1, 0))
        return jax.lax.conv_general_dilated(
            v, w_hwio, (s, s), pad, dimension_numbers=("NHWC", "HWIO", "NHWC"))

    def bn(v, g, b, m, var):
        return (v - m) / jnp.sqrt(var + eps) * g + b

    y = jax.nn.relu(bn(conv(x, raw["conv1_w"], 1, "VALID"),
                       raw["bn1_g"], raw["bn1_b"], raw["bn1_m"], raw["bn1_v"]))
    y = jax.nn.relu(bn(conv(y, raw["conv2_w"], stride, [(1, 1), (1, 1)]),
                       raw["bn2_g"], raw["bn2_b"], raw["bn2_m"], raw["bn2_v"]))
    y = bn(conv(y, raw["conv3_w"], 1, "VALID"),
           raw["bn3_g"], raw["bn3_b"], raw["bn3_m"], raw["bn3_v"])
    y = jax.nn.relu(y + x)
    return jnp.transpose(y, (0, 3, 1, 2))


# --------------------------------------------------------------------------
# Demo
# --------------------------------------------------------------------------
def make_raw_params(key, c_in, c_mid, c_out):
    ks = iter(jax.random.split(key, 15))

    def nrm(shape, s=0.1):
        return s * jax.random.normal(next(ks), shape, dtype=jnp.float32)

    def bn(c):
        return (1.0 + nrm((c,)), nrm((c,)), nrm((c,)),
                0.5 + jax.random.uniform(next(ks), (c,), dtype=jnp.float32))

    raw = {
        "conv1_w": nrm((c_mid, c_in, 1, 1)),     # PyTorch (out, in, kh, kw)
        "conv2_w": nrm((c_mid, c_mid, 3, 3)),
        "conv3_w": nrm((c_out, c_mid, 1, 1)),
    }
    raw["bn1_g"], raw["bn1_b"], raw["bn1_m"], raw["bn1_v"] = bn(c_mid)
    raw["bn2_g"], raw["bn2_b"], raw["bn2_m"], raw["bn2_v"] = bn(c_mid)
    raw["bn3_g"], raw["bn3_b"], raw["bn3_m"], raw["bn3_v"] = bn(c_out)
    return raw


if __name__ == "__main__":
    # Bottleneck(in_channel=32, out_channel=8, stride=1, downsample=None)
    N, C_MID = 2, 8
    C_IN = C_OUT = C_MID * 4      # expansion = 4
    H = W = 16
    STRIDE = 1

    key = jax.random.PRNGKey(0)
    kx, kp = jax.random.split(key)
    x = jax.random.normal(kx, (N, C_IN, H, W), dtype=jnp.float32)   # NCHW like PyTorch
    raw = make_raw_params(kp, C_IN, C_MID, C_OUT)

    ref = jax.block_until_ready(bottleneck_reference(x, raw, stride=STRIDE))

    # f32 path (tight check against the eval-mode PyTorch semantics)
    prep_f32 = prepare_params(raw, compute_dtype=jnp.float32)
    out = jax.block_until_ready(bottleneck_forward(x, prep_f32, stride=STRIDE))
    assert out.shape == (N, C_OUT, H, W)
    assert jnp.allclose(out, ref, rtol=1e-3, atol=1e-3), "f32 kernel mismatch vs reference"

    # bf16 compute path (f32 accumulation / epilogue / residual) — loose check
    prep_bf16 = prepare_params(raw, compute_dtype=jnp.bfloat16)
    out16 = jax.block_until_ready(bottleneck_forward(x, prep_bf16, stride=STRIDE))
    assert out16.shape == (N, C_OUT, H, W)
    assert jnp.allclose(out16, ref, rtol=2e-1, atol=2e-1), "bf16 kernel mismatch vs reference"

    print("KERNEL_OK")
</pallas_src>

<mosaic_0001>
module attributes {stable_mosaic.version = 11 : i64} {
  func.func @_bottleneck_kernel(%arg0: i32, %arg1: memref<1x256x32xf32, #tpu.memory_space<vmem>>, %arg2: memref<32x8xf32, #tpu.memory_space<vmem>>, %arg3: memref<1x8xf32, #tpu.memory_space<vmem>>, %arg4: memref<3x24x8xf32, #tpu.memory_space<vmem>>, %arg5: memref<1x8xf32, #tpu.memory_space<vmem>>, %arg6: memref<8x32xf32, #tpu.memory_space<vmem>>, %arg7: memref<1x32xf32, #tpu.memory_space<vmem>>, %arg8: memref<1x256x32xf32, #tpu.memory_space<vmem>>, %arg9: memref<304x24xf32, #tpu.memory_space<vmem>>) attributes {dimension_semantics = [#tpu.dimension_semantics<parallel>], iteration_bounds = array<i64: 2>, scalar_prefetch = 0 : i64, scratch_operands = 1 : i64, tpu.core_type = #tpu.core_type<tc>, window_params = [{transform_indices = @transform_0, window_bounds = array<i64: 1, 256, 32>}, {pipeline_mode = #tpu.pipeline_mode<synchronous>, transform_indices = @transform_1, window_bounds = array<i64: 32, 8>}, {pipeline_mode = #tpu.pipeline_mode<synchronous>, transform_indices = @transform_2, window_bounds = array<i64: 1, 8>}, {pipeline_mode = #tpu.pipeline_mode<synchronous>, transform_indices = @transform_3, window_bounds = array<i64: 3, 24, 8>}, {pipeline_mode = #tpu.pipeline_mode<synchronous>, transform_indices = @transform_4, window_bounds = array<i64: 1, 8>}, {pipeline_mode = #tpu.pipeline_mode<synchronous>, transform_indices = @transform_5, window_bounds = array<i64: 8, 32>}, {pipeline_mode = #tpu.pipeline_mode<synchronous>, transform_indices = @transform_6, window_bounds = array<i64: 1, 32>}, {transform_indices = @transform_7, window_bounds = array<i64: 1, 256, 32>}]} {
    %c0 = arith.constant 0 : index
    %c0_0 = arith.constant 0 : index
    %c0_1 = arith.constant 0 : index
    %0 = vector.load %arg1[%c0, %c0_0, %c0_1] : memref<1x256x32xf32, #tpu.memory_space<vmem>>, vector<1x256x32xf32>
    %1 = vector.shape_cast %0 : vector<1x256x32xf32> to vector<256x32xf32>
    %c0_2 = arith.constant 0 : index
    %c0_3 = arith.constant 0 : index
    %2 = vector.load %arg2[%c0_2, %c0_3] : memref<32x8xf32, #tpu.memory_space<vmem>>, vector<32x8xf32>
    %cst = arith.constant dense<0.000000e+00> : vector<256x8xf32>
    %3 = tpu.matmul %1, %2, %cst {dimension_numbers = #tpu.dot_dimension_numbers<[1], [0], [0], [1], [0, 0, 1, 1], [], []>} : vector<256x32xf32>, vector<32x8xf32>, vector<256x8xf32> -> vector<256x8xf32>
    %c0_4 = arith.constant 0 : index
    %c0_5 = arith.constant 0 : index
    %4 = vector.load %arg3[%c0_4, %c0_5] : memref<1x8xf32, #tpu.memory_space<vmem>>, vector<1x8xf32>
    %5 = vector.broadcast %4 : vector<1x8xf32> to vector<256x8xf32>
    %6 = arith.addf %3, %5 : vector<256x8xf32>
    %cst_6 = arith.constant 0.000000e+00 : f32
    %7 = vector.broadcast %cst_6 : f32 to vector<256x8xf32>
    %8 = arith.maximumf %6, %7 : vector<256x8xf32>
    %9 = tpu.iota {dimensions = array<i32: 0>} : vector<256x1xi32>
    %c16_i32 = arith.constant 16 : i32
    %c0_i32 = arith.constant 0 : i32
    %10 = arith.cmpi eq, %c16_i32, %c0_i32 : i32
    %c1_i32 = arith.constant 1 : i32
    %11 = arith.select %10, %c1_i32, %c16_i32 : i32
    %12 = vector.broadcast %11 : i32 to vector<256x1xi32>
    %13 = arith.remsi %9, %12 : vector<256x1xi32>
    %c0_i32_7 = arith.constant 0 : i32
    %14 = vector.broadcast %c0_i32_7 : i32 to vector<256x1xi32>
    %15 = arith.cmpi ne, %13, %14 : vector<256x1xi32>
    %c0_i32_8 = arith.constant 0 : i32
    %16 = vector.broadcast %c0_i32_8 : i32 to vector<256x1xi32>
    %17 = arith.cmpi slt, %13, %16 : vector<256x1xi32>
    %c0_i32_9 = arith.constant 0 : i32
    %18 = arith.cmpi slt, %11, %c0_i32_9 : i32
    %19 = vector.broadcast %18 : i1 to vector<256x1xi1>
    %20 = vector.broadcast %19 : vector<256x1xi1> to vector<256x1xi1>
    %21 = arith.xori %17, %20 : vector<256x1xi1>
    %22 = arith.andi %21, %15 : vector<256x1xi1>
    %23 = vector.broadcast %11 : i32 to vector<256x1xi32>
    %24 = arith.addi %13, %23 : vector<256x1xi32>
    %25 = arith.select %22, %24, %13 : vector<256x1xi1>, vector<256x1xi32>
    %c0_i32_10 = arith.constant 0 : i32
    %26 = vector.broadcast %c0_i32_10 : i32 to vector<256x1xi32>
    %27 = arith.cmpi ne, %25, %26 : vector<256x1xi32>
    %28 = arith.extui %27 : vector<256x1xi1> to vector<256x1xi32>
    %29 = arith.sitofp %28 : vector<256x1xi32> to vector<256x1xf32>
    %c15_i32 = arith.constant 15 : i32
    %30 = vector.broadcast %c15_i32 : i32 to vector<256x1xi32>
    %31 = arith.cmpi ne, %25, %30 : vector<256x1xi32>
    %32 = arith.extui %31 : vector<256x1xi1> to vector<256x1xi32>
    %33 = arith.sitofp %32 : vector<256x1xi32> to vector<256x1xf32>
    %cst_11 = arith.constant 0.000000e+00 : f32
    %34 = vector.broadcast %cst_11 : f32 to vector<25x24xf32>
    %c0_12 = arith.constant 0 : index
    %c0_13 = arith.constant 0 : index
    %35 = vector.load %arg9[%c0_12, %c0_13] : memref<304x24xf32, #tpu.memory_space<vmem>>, vector<25x24xf32>
    tpu.vector_store %arg9[%c0_12, %c0_13], %34 {strides = array<i32>} : memref<304x24xf32, #tpu.memory_space<vmem>>, vector<25x24xf32>,
    %cst_14 = arith.constant 0.000000e+00 : f32
    %36 = vector.broadcast %cst_14 : f32 to vector<25x24xf32>
    %c279 = arith.constant 279 : index
    %c0_15 = arith.constant 0 : index
    %37 = vector.load %arg9[%c279, %c0_15] : memref<304x24xf32, #tpu.memory_space<vmem>>, vector<25x24xf32>
    tpu.vector_store %arg9[%c279, %c0_15], %36 {strides = array<i32>} : memref<304x24xf32, #tpu.memory_space<vmem>>, vector<25x24xf32>,
    %38 = vector.broadcast %33 : vector<256x1xf32> to vector<256x8xf32>
    %39 = arith.mulf %8, %38 : vector<256x8xf32>
    %c25 = arith.constant 25 : index
    %c0_16 = arith.constant 0 : index
    %40 = vector.load %arg9[%c25, %c0_16] : memref<304x24xf32, #tpu.memory_space<vmem>>, vector<256x8xf32>
    tpu.vector_store %arg9[%c25, %c0_16], %39 {strides = array<i32>} : memref<304x24xf32, #tpu.memory_space<vmem>>, vector<256x8xf32>,
    %c24 = arith.constant 24 : index
    %c8 = arith.constant 8 : index
    %41 = vector.load %arg9[%c24, %c8] : memref<304x24xf32, #tpu.memory_space<vmem>>, vector<256x8xf32>
    tpu.vector_store %arg9[%c24, %c8], %8 {strides = array<i32>} : memref<304x24xf32, #tpu.memory_space<vmem>>, vector<256x8xf32>,
    %42 = vector.broadcast %29 : vector<256x1xf32> to vector<256x8xf32>
    %43 = arith.mulf %8, %42 : vector<256x8xf32>
    %c23 = arith.constant 23 : index
    %c16 = arith.constant 16 : index
    %44 = vector.load %arg9[%c23, %c16] : memref<304x24xf32, #tpu.memory_space<vmem>>, vector<256x8xf32>
    tpu.vector_store %arg9[%c23, %c16], %43 {strides = array<i32>} : memref<304x24xf32, #tpu.memory_space<vmem>>, vector<256x8xf32>,
    %c8_17 = arith.constant 8 : index
    %c0_18 = arith.constant 0 : index
    %45 = vector.load %arg9[%c8_17, %c0_18] : memref<304x24xf32, #tpu.memory_space<vmem>>, vector<256x24xf32>
    %c0_19 = arith.constant 0 : index
    %c0_20 = arith.constant 0 : index
    %c0_21 = arith.constant 0 : index
    %46 = vector.load %arg4[%c0_19, %c0_20, %c0_21] : memref<3x24x8xf32, #tpu.memory_space<vmem>>, vector<1x24x8xf32>
    %47 = vector.shape_cast %46 : vector<1x24x8xf32> to vector<24x8xf32>
    %cst_22 = arith.constant dense<0.000000e+00> : vector<256x8xf32>
    %48 = tpu.matmul %45, %47, %cst_22 {dimension_numbers = #tpu.dot_dimension_numbers<[1], [0], [0], [1], [0, 0, 1, 1], [], []>} : vector<256x24xf32>, vector<24x8xf32>, vector<256x8xf32> -> vector<256x8xf32>
    %c24_23 = arith.constant 24 : index
    %c0_24 = arith.constant 0 : index
    %49 = vector.load %arg9[%c24_23, %c0_24] : memref<304x24xf32, #tpu.memory_space<vmem>>, vector<256x24xf32>
    %c1 = arith.constant 1 : index
    %c0_25 = arith.constant 0 : index
    %c0_26 = arith.constant 0 : index
    %50 = vector.load %arg4[%c1, %c0_25, %c0_26] : memref<3x24x8xf32, #tpu.memory_space<vmem>>, vector<1x24x8xf32>
    %51 = vector.shape_cast %50 : vector<1x24x8xf32> to vector<24x8xf32>
    %cst_27 = arith.constant dense<0.000000e+00> : vector<256x8xf32>
    %52 = tpu.matmul %49, %51, %cst_27 {dimension_numbers = #tpu.dot_dimension_numbers<[1], [0], [0], [1], [0, 0, 1, 1], [], []>} : vector<256x24xf32>, vector<24x8xf32>, vector<256x8xf32> -> vector<256x8xf32>
    %53 = arith.addf %48, %52 : vector<256x8xf32>
    %c40 = arith.constant 40 : index
    %c0_28 = arith.constant 0 : index
    %54 = vector.load %arg9[%c40, %c0_28] : memref<304x24xf32, #tpu.memory_space<vmem>>, vector<256x24xf32>
    %c2 = arith.constant 2 : index
    %c0_29 = arith.constant 0 : index
    %c0_30 = arith.constant 0 : index
    %55 = vector.load %arg4[%c2, %c0_29, %c0_30] : memref<3x24x8xf32, #tpu.memory_space<vmem>>, vector<1x24x8xf32>
    %56 = vector.shape_cast %55 : vector<1x24x8xf32> to vector<24x8xf32>
    %cst_31 = arith.constant dense<0.000000e+00> : vector<256x8xf32>
    %57 = tpu.matmul %54, %56, %cst_31 {dimension_numbers = #tpu.dot_dimension_numbers<[1], [0], [0], [1], [0, 0, 1, 1], [], []>} : vector<256x24xf32>, vector<24x8xf32>, vector<256x8xf32> -> vector<256x8xf32>
    %58 = arith.addf %53, %57 : vector<256x8xf32>
    %c0_32 = arith.constant 0 : index
    %c0_33 = arith.constant 0 : index
    %59 = vector.load %arg5[%c0_32, %c0_33] : memref<1x8xf32, #tpu.memory_space<vmem>>, vector<1x8xf32>
    %60 = vector.broadcast %59 : vector<1x8xf32> to vector<256x8xf32>
    %61 = arith.addf %58, %60 : vector<256x8xf32>
    %cst_34 = arith.constant 0.000000e+00 : f32
    %62 = vector.broadcast %cst_34 : f32 to vector<256x8xf32>
    %63 = arith.maximumf %61, %62 : vector<256x8xf32>
    %c0_35 = arith.constant 0 : index
    %c0_36 = arith.constant 0 : index
    %64 = vector.load %arg6[%c0_35, %c0_36] : memref<8x32xf32, #tpu.memory_space<vmem>>, vector<8x32xf32>
    %cst_37 = arith.constant dense<0.000000e+00> : vector<256x32xf32>
    %65 = tpu.matmul %63, %64, %cst_37 {dimension_numbers = #tpu.dot_dimension_numbers<[1], [0], [0], [1], [0, 0, 1, 1], [], []>} : vector<256x8xf32>, vector<8x32xf32>, vector<256x32xf32> -> vector<256x32xf32>
    %c0_38 = arith.constant 0 : index
    %c0_39 = arith.constant 0 : index
    %66 = vector.load %arg7[%c0_38, %c0_39] : memref<1x32xf32, #tpu.memory_space<vmem>>, vector<1x32xf32>
    %67 = vector.broadcast %66 : vector<1x32xf32> to vector<256x32xf32>
    %68 = arith.addf %65, %67 : vector<256x32xf32>
    %69 = arith.addf %68, %1 : vector<256x32xf32>
    %cst_40 = arith.constant 0.000000e+00 : f32
    %70 = vector.broadcast %cst_40 : f32 to vector<256x32xf32>
    %71 = arith.maximumf %69, %70 : vector<256x32xf32>
    %c0_41 = arith.constant 0 : index
    %c0_42 = arith.constant 0 : index
    %c0_43 = arith.constant 0 : index
    %72 = vector.load %arg8[%c0_41, %c0_42, %c0_43] : memref<1x256x32xf32, #tpu.memory_space<vmem>>, vector<1x256x32xf32>
    %73 = vector.shape_cast %72 : vector<1x256x32xf32> to vector<256x32xf32>
    %74 = vector.shape_cast %71 : vector<256x32xf32> to vector<1x256x32xf32>
    tpu.vector_store %arg8[%c0_41, %c0_42, %c0_43], %74 {strides = array<i32>} : memref<1x256x32xf32, #tpu.memory_space<vmem>>, vector<1x256x32xf32>,
    return
  }
  func.func @transform_0(%arg0: i32) -> (i32, i32, i32) {
    %c0_i32 = arith.constant 0 : i32
    %c0_i32_0 = arith.constant 0 : i32
    %c0_i32_1 = arith.constant 0 : i32
    return %arg0, %c0_i32, %c0_i32_0 : i32, i32, i32
  }
  func.func @transform_1(%arg0: i32) -> (i32, i32) {
    %c0_i32 = arith.constant 0 : i32
    %c0_i32_0 = arith.constant 0 : i32
    %c0_i32_1 = arith.constant 0 : i32
    return %c0_i32, %c0_i32_0 : i32, i32
  }
  func.func @transform_2(%arg0: i32) -> (i32, i32) {
    %c0_i32 = arith.constant 0 : i32
    %c0_i32_0 = arith.constant 0 : i32
    %c0_i32_1 = arith.constant 0 : i32
    return %c0_i32, %c0_i32_0 : i32, i32
  }
  func.func @transform_3(%arg0: i32) -> (i32, i32, i32) {
    %c0_i32 = arith.constant 0 : i32
    %c0_i32_0 = arith.constant 0 : i32
    %c0_i32_1 = arith.constant 0 : i32
    %c0_i32_2 = arith.constant 0 : i32
    return %c0_i32, %c0_i32_0, %c0_i32_1 : i32, i32, i32
  }
  func.func @transform_4(%arg0: i32) -> (i32, i32) {
    %c0_i32 = arith.constant 0 : i32
    %c0_i32_0 = arith.constant 0 : i32
    %c0_i32_1 = arith.constant 0 : i32
    return %c0_i32, %c0_i32_0 : i32, i32
  }
  func.func @transform_5(%arg0: i32) -> (i32, i32) {
    %c0_i32 = arith.constant 0 : i32
    %c0_i32_0 = arith.constant 0 : i32
    %c0_i32_1 = arith.constant 0 : i32
    return %c0_i32, %c0_i32_0 : i32, i32
  }
  func.func @transform_6(%arg0: i32) -> (i32, i32) {
    %c0_i32 = arith.constant 0 : i32
    %c0_i32_0 = arith.constant 0 : i32
    %c0_i32_1 = arith.constant 0 : i32
    return %c0_i32, %c0_i32_0 : i32, i32
  }
  func.func @transform_7(%arg0: i32) -> (i32, i32, i32) {
    %c0_i32 = arith.constant 0 : i32
    %c0_i32_0 = arith.constant 0 : i32
    %c0_i32_1 = arith.constant 0 : i32
    return %arg0, %c0_i32, %c0_i32_0 : i32, i32, i32
  }
}

</mosaic_0001>

<bundles_post_ra>
// kernel: bottleneck_forward.1
= control target key start
LH: loop header
LB: loop body
LE: loop exit
PB: predicated region body
PF: predicated region fallthrough
CT: control target
= control target key end

     0   :  { %12 = vsyncpa [#allocation4], 0  ;;  %s5351_s0 = inlined_call_operand.hbm [shape: f32[2,256,32], index: 0, kind: input, shape index: {}]   ;;  %s5352_s1 = inlined_call_operand.vmem [shape: f32[32,8], index: 1, kind: input, shape index: {}]   ;;  %s5353_s2 = inlined_call_operand.vmem [shape: f32[1,8], index: 2, kind: input, shape index: {}]   ;;  %s5354_s3 = inlined_call_operand.vmem [shape: f32[3,24,8], index: 3, kind: input, shape index: {}]   ;;  %s5355_s4 = inlined_call_operand.vmem [shape: f32[1,8], index: 4, kind: input, shape index: {}]   ;;  %s5356_s5 = inlined_call_operand.vmem [shape: f32[8,32], index: 5, kind: input, shape index: {}]   ;;  %s5357_s6 = inlined_call_operand.vmem [shape: f32[1,32], index: 6, kind: input, shape index: {}]   ;;  %s5358_s7 = inlined_call_operand.hbm [shape: f32[2,256,32], index: 7, kind: output, shape index: {}]  }
   0x1   :  { %14 = vsyncpa [#allocation4 + $0x1], 0 }
   0x2   :  { %15 = vsyncpa [#allocation5], 0 }
   0x3   :  { %17 = vsyncpa [#allocation5 + $0x1], 0  ;;  %s4274_s24 = smov 0   ;;  %s4276_s25 = smov 0  }
   0x4   :  { %s4278_s26 = smov 0   ;;  %s4280_s27 = smov 0  }
   0x5 LB: > { %s4295_s28 = sadd.s32 4294967295, %s4224_s27   ;;  %s3297_s29 = sadd.s32 4294967294, %s4224_s27   ;;  %s4224_s27 = sphi %s4280_s27, %s5377_s27   ;;  %s4220_s26 = sphi %s4278_s26, %s5376_s26   ;;  %s4216_s25 = sphi %s4276_s25, %s5375_s25   ;;  %s4212_s24 = sphi %s4274_s24, %s5374_s24  }
   0x6   : > { %s4299_s30 = sadd.s32 1, %s4224_s27   ;;  %s30_s8 = sadd.s32 1, %s4220_s26 }
   0x7   : > { %s27_s9 = ssub.s32 %s4224_s27, %s4299_s30  ;;  %p37_p0 = scmp.ne.s32.totalorder %s4220_s26, %s4216_s25 }
   0x8   : > { %p28_p1 = scmp.eq.s32.totalorder %s27_s9, 0  ;;  %p38_p2 = scmp.eq.s32.totalorder %s4224_s27, 0 }
   0x9   : > { %p43_p3 = scmp.ne.s32.totalorder %s4216_s25, %s4212_s24  ;;  %p44_p4 = scmp.eq.s32.totalorder %s4295_s28, 0 }
   0xa   : > { %s4311_s10 = scalar_select %p28_p1, %s4220_s26, %s30_s8  }
   0xb   : > { %p4313_p5 = por %p38_p2, %p37_p0  ;;  %p4317_p6 = por %p44_p4, %p43_p3 }
   0xc   : > { %p193_p7 = scmp.eq.s32.totalorder %s4295_s28, 1  ;;  %p199_p8 = scmp.eq.s32.totalorder %s3297_s29, 1 }
   0xd   : > { %p4056_p10 = scmp.lt.s32.totalorder %s4224_s27, 2  ;;  %s237_s15 = sand.u32 1, %s4220_s26  }
   0xe   : > { %p4324_p11 = por %p193_p7, %p37_p0  ;;  %p4328_p12 = por %p199_p8, %p43_p3 }
   0xf   : > { %s3512_s16 = sshll.u32 %s4224_s27, 12  ;;  %s3300_s17 = sshll.u32 %s237_s15, 8 }
  0x10   : > { %s5362_s13 = scalar_select %p4324_p11, 1, 0 }
  0x11   : > { %s5363_s14 = scalar_select %p4328_p12, 1, 0 }
  0x12   : > { %s4337_s20 = scalar_lea.hbm %s5351_s0, %s3512_s16  ;;  %s241_s21 = scalar_lea.vmem [#allocation3], %s3300_s17 }
  0x13   : > { %s248_s22 = sshll.u32 %s241_s21, 4  ;;  %p4341_p13 = pnand %p4056_p10, %p4313_p5  ;;  %s4345_s22 = int_to_ptr.vmem [resolvable:$true] %s248_s22 }
  0x14   : > { %s4347_s29 = scalar_lea.sflag [#allocation4], %s237_s15  ;;  %s4128_s8 = scalar_lea.hbm %s4337_s20, 4096 }
  0x15   : > { %p4129_p0 = scmp.ne.s32.totalorder %s4337_s20, %s4128_s8  ;;  %p4130_p1 = pneg %p4341_p13 }
  0x16   : > { %s4133_s16 = scalar_lea.hbm %s5351_s0, 8192  ;;  %p4134_p4 = scmp.lt.u32.totalorder %s4337_s20, %s5351_s0 }
  0x17   : > { %p4131_p2 = pnand %p4130_p1, %p4129_p0  ;;  %p4135_p5 = scmp.lt.u32.totalorder %s4133_s16, %s4128_s8 }
  0x18   : > { %p4137_p8 = scmp.lt.u32.totalorder %s4128_s8, %s4337_s20 }
  0x19   : > { %p4132_p3 = pneg %p4131_p2  ;;  %p4136_p7 = por %p4135_p5, %p4134_p4 }
  0x1b   : > { %p4138_p10 = por %p4137_p8, %p4136_p7 }
  0x1d   : > { %p4139_p9 = pnand %p4138_p10, %p4132_p3 }
  0x1f   : > { %4142 = shalt.err (!%p4139_p9)
}
  0x20   : > { %s4143_s15 = scalar_lea.vmem %s4345_s22, 4096  ;;  %s4226_s19 = smov [#allocation3]  }
  0x21   : > { %p4144_p0 = scmp.ne.s32.totalorder %s4345_s22, %s4143_s15  ;;  %s4148_s21 = sshll.u32 %s4226_s19, 4  ;;  %s4149_s21 = int_to_ptr.vmem [resolvable:$false] %s4148_s21 }
  0x22   : > { %s4150_s9 = scalar_lea.vmem %s4149_s21, 8192  ;;  %p4151_p11 = scmp.lt.s32.totalorder %s4345_s22, %s4149_s21 }
  0x23   : > { %p4146_p2 = pnand %p4144_p0, %p4130_p1  ;;  %p4152_p4 = scmp.lt.s32.totalorder %s4150_s9, %s4143_s15 }
  0x25   : > { %p4147_p12 = pneg %p4146_p2  ;;  %p4153_p5 = por %p4152_p4, %p4151_p11 }
  0x27   : > { %p4154_p7 = pnand %p4153_p5, %p4147_p12 }
  0x29   : > { %4157 = shalt.err (!%p4154_p7)
}
  0x2a   : > { %s4227_s8 = smov 128   ;;  %s4228_s11 = smov 8  }
  0x2b   : > { %4051 = dma.hbm_to_vmem [thread:$0]  (!%p4341_p13), %s4337_s20, 4096, %s4345_s22, %s4347_s29, %s4227_s8, %s4227_s8, %s4228_s11  }
  0x2c   : > { %p3303_p9 = scmp.ge.s32.totalorder %s4224_s27, 1  ;;  %p256_p1 = scmp.lt.s32.totalorder %s4224_s27, 3 }
  0x2e   : > { %p257_p3 = pnand %p3303_p9, %p256_p1 }
  0x2f   : > { %s4378_s16 = sand.u32 (!%p257_p3), 1, %s4216_s25  }
  0x30   : > { %260 = sbr.rel (%p257_p3) target bundleno = 1089 (0x441), region = 48  ;;  %s3304_s17 = sshll.u32 (!%p257_p3), %s4378_s16, 8 }
  0x31   : > { %s263_s18 = scalar_lea.sflag (!%p257_p3), [#allocation4], %s4378_s16  ;;  %s4384_s15 = scalar_lea.vmem (!%p257_p3), [#allocation3], %s3304_s17 }
  0x37   : > { %4203 = dma.done.wait (%p4317_p6), %s263_s18, 4096  }
  0x38   : > { %4205 = vsyncadd (%p4317_p6), %s263_s18, 4294963200  ;;  %vm1303_vm0 = vcmask 195584   ;;  %v4229_v0 = vmov 0.0   ;;  %vm340_vm1 = vcmask 261120   ;;  %v329_v1 = vld [vmem:[%s5352_s1] sm:$0xff]  ;;  %v330_v2 = vld [vmem:[%s5352_s1 + $0x8] sm:$0xff]  ;;  %v694_v39 = vlaneseq }
  0x39   : > { %1305 = vst.msk [vmem:[#allocation2 + $0x8] sm:$0xff] %vm1303_vm0, %v4229_v0  ;;  %1306 = vst.msk [vmem:[#allocation2 + $0x10] sm:$0xff] %vm1303_vm0, %v4229_v0  ;;  %v331_v3 = vld [vmem:[%s5352_s1 + $0x10] sm:$0xff]  ;;  %v3956_v4 = vpack.c.bf16 %v330_v2, %v329_v1  ;;  %v332_v5 = vld [vmem:[%s5352_s1 + $0x18] sm:$0xff]  ;;  %vm1307_vm3 = vcmask 188416   ;;  %vm1345_vm5 = vcmask 64512  }
  0x3a   : > { %1309 = vst.msk [vmem:[#allocation2 + $0x117] sm:$0xff] %vm1303_vm0, %v4229_v0  ;;  %1310 = vst.msk [vmem:[#allocation2 + $0x11f] sm:$0xff] %vm1303_vm0, %v4229_v0  ;;  %v297_v6 = vld [vmem:[%s4384_s15] sm:$0xff]  ;;  %v3960_v7 = vpack.c.bf16 %v332_v5, %v331_v3  ;;  %v298_v8 = vld [vmem:[%s4384_s15 + $0x8] sm:$0xff]  ;;  %v4476_v40 = vshrl.u32 %v694_v39, 7  ;;  %s4230_s23 = smov 8  }
  0x3b   : > { %1311 = vst.msk [vmem:[#allocation2 + $0x127] sm:$0xff] %vm1303_vm0, %v4229_v0  ;;  %3696 = vmatprep.mubr.msk.f32.mxu0 %vm340_vm1, %v297_v6  ;;  %3957 = vmatprep.subr.bf16.mxu0 %v3956_v4  ;;  %v299_v9 = vld [vmem:[%s4384_s15 + $0x10] sm:$0xff]  ;;  %v300_v10 = vld [vmem:[%s4384_s15 + $0x18] sm:$0xff]  ;;  %v301_v11 = vld [vmem:[%s4384_s15 + $0x20] sm:$0xff]  ;;  %s4231_s29 = smov 16   ;;  %s5175_s19 = scalar_lea.vmem [#allocation6], %s3304_s17 }
  0x3c   : > { %3959 = vmatpush3.bf16.msra.mxu0 %v3956_v4  ;;  %v302_v12 = vld [vmem:[%s4384_s15 + $0x28] sm:$0xff]  ;;  %v303_v13 = vld [vmem:[%s4384_s15 + $0x30] sm:$0xff]  ;;  %v304_v14 = vld [vmem:[%s4384_s15 + $0x38] sm:$0xff]  ;;  %v696_v41 = vadd.s32 8, %v4476_v40  ;;  %v698_v43 = vadd.s32 24, %v4476_v40  ;;  %v731_v44 = vand.u32 15, %v4476_v40 }
  0x3d   : > { %3961 = vmatprep.subr.bf16.mxu0 %v3960_v7  ;;  %v305_v15 = vld [vmem:[%s4384_s15 + $0x40] sm:$0xff]  ;;  %v306_v16 = vld [vmem:[%s4384_s15 + $0x48] sm:$0xff]  ;;  %v307_v17 = vld [vmem:[%s4384_s15 + $0x50] sm:$0xff]  ;;  %v700_v47 = vadd.s32 40, %v4476_v40  ;;  %1308 = vst.msk [vmem:[#allocation2 + $0x18] sm:$0x1] %vm1307_vm3, %v4229_v0 }
  0x3e   : > { %v308_v18 = vld [vmem:[%s4384_s15 + $0x58] sm:$0xff]  ;;  %v309_v19 = vld [vmem:[%s4384_s15 + $0x60] sm:$0xff]  ;;  %v310_v20 = vld [vmem:[%s4384_s15 + $0x68] sm:$0xff]  ;;  %v738_v42 = vand.u32 15, %v696_v41  ;;  %v752_v46 = vand.u32 15, %v698_v43  ;;  %vm1111_vm4 = vcmp.ne.s32.totalorder %v731_v44, 0 }
  0x3f   : > { %v311_v21 = vld [vmem:[%s4384_s15 + $0x70] sm:$0xff]  ;;  %v312_v22 = vld [vmem:[%s4384_s15 + $0x78] sm:$0xff]  ;;  %v313_v23 = vld [vmem:[%s4384_s15 + $0x80] sm:$0xff]  ;;  %v697_v49 = vadd.s32 16, %v4476_v40  ;;  %v3339_v55 = vsel %vm1111_vm4, 1.0, %v4229_v0  ;;  %v766_v59 = vand.u32 15, %v700_v47 }
  0x40   : > { %3963 = vmatpush3.bf16.msra.mxu0 %v3960_v7  ;;  %v314_v24 = vld [vmem:[%s4384_s15 + $0x88] sm:$0xff]  ;;  %v315_v25 = vld [vmem:[%s4384_s15 + $0x90] sm:$0xff]  ;;  %v316_v26 = vld [vmem:[%s4384_s15 + $0x98] sm:$0xff]  ;;  %vm1208_vm2 = vcmp.ne.s32.totalorder %v738_v42, 15  ;;  %vm4492_vm6 = vcmp.ne.s32.totalorder %v752_v46, 15  ;;  %v702_v60 = vadd.s32 56, %v4476_v40 }
  0x41   : > { %v317_v27 = vld [vmem:[%s4384_s15 + $0xa0] sm:$0xff]  ;;  %v318_v28 = vld [vmem:[%s4384_s15 + $0xa8] sm:$0xff]  ;;  %v319_v29 = vld [vmem:[%s4384_s15 + $0xb0] sm:$0xff]  ;;  %v3355_v51 = vsel %vm1208_vm2, 1.0, %v4229_v0  ;;  %v745_v1 = vand.u32 15, %v697_v49  ;;  %v3356_v5 = vsel %vm4492_vm6, 1.0, %v4229_v0 }
  0x42   : > { %v320_v30 = vld [vmem:[%s4384_s15 + $0xb8] sm:$0xff]  ;;  %v321_v31 = vld [vmem:[%s4384_s15 + $0xc0] sm:$0xff]  ;;  %v322_v32 = vld [vmem:[%s4384_s15 + $0xc8] sm:$0xff]  ;;  %vm4514_vm7 = vcmp.ne.s32.totalorder %v766_v59, 15  ;;  %v712_v59 = vadd.s32 136, %v4476_v40  ;;  %s3513_s17 = sshll.u32 %s4295_s28, 12 }
  0x43   : > { %3697 = vmatmul.mubr.msk.f32.vlgmr.msra.gmra.mrb[0].mxu0 %vm340_vm1, %v298_v8  ;;  %v323_v33 = vld [vmem:[%s4384_s15 + $0xd0] sm:$0xff]  ;;  %v324_v34 = vld [vmem:[%s4384_s15 + $0xd8] sm:$0xff]  ;;  %v325_v35 = vld [vmem:[%s4384_s15 + $0xe0] sm:$0xff]  ;;  %vm4520_vm8 = vcmp.ne.s32.totalorder %v745_v1, 0  ;;  %s3224_s21 = sshll.u32 %s5175_s19, 4  ;;  %s5300_s11 = scalar_lea.hbm %s5358_s7, %s3513_s17  ;;  %s5302_s21 = int_to_ptr.vmem [resolvable:$true] %s3224_s21 }
  0x44   : > { %3699 = vmatprep.mubr.msk.f32.mxu0 %vm340_vm1, %v299_v9  ;;  %v326_v36 = vld [vmem:[%s4384_s15 + $0xe8] sm:$0xff]  ;;  %v327_v37 = vld [vmem:[%s4384_s15 + $0xf0] sm:$0xff]  ;;  %v328_v38 = vld [vmem:[%s4384_s15 + $0xf8] sm:$0xff]  ;;  %s3211_s28 = scalar_lea.sflag [#allocation5], %s4378_s16  ;;  %s4158_s18 = scalar_lea.vmem %s5302_s21, 4096 }
  0x45   : > { %v4484_v45 = vld [vmem:[%s5353_s2] ss:$0 sm:$0xff]  ;;  %v3371_v56 = vld [vmem:[%s5354_s3 + $0x18] sm:$0xff]  ;;  %p4159_p6 = scmp.ne.s32.totalorder %s5302_s21, %s4158_s18  ;;  %p5371_p11 = scmp.ne.s32.totalorder %s5362_s13, 0 }
  0x46   : > { %v3372_v57 = vld [vmem:[%s5354_s3 + $0x20] sm:$0xff] }
  0x47   : > { %3700 = vmatmul.mubr.msk.f32.gmra.mrb[2].mxu0 %vm340_vm1, %v300_v10  ;;  %v3964_v61 = vpack.c.bf16 %v3372_v57, %v3371_v56  ;;  %v780_v10 = vand.u32 15, %v702_v60  ;;  %v709_v60 = vadd.s32 112, %v4476_v40  ;;  %p4160_p12 = pnand %p4159_p6, %p5371_p11 }
  0x48   : > { %3702 = vmatprep.mubr.msk.f32.mxu0 %vm340_vm1, %v301_v11  ;;  %v704_v11 = vadd.s32 72, %v4476_v40 }
  0x49   : > { %3965 = vmatprep.subr.bf16.mxu0 %v3964_v61  ;;  %3976 = vmatprep.subr.bf16.mxu1 %v3964_v61  ;;  %vm1214_vm9 = vcmp.ne.s32.totalorder %v780_v10, 15  ;;  %v829_v9 = vand.u32 15, %v709_v60  ;;  %p4161_p13 = pneg %p4160_p12 }
  0x4a   : > { %3967 = vmatpush3.bf16.msra.mxu0 %v3964_v61  ;;  %3978 = vmatpush3.bf16.msra.mxu1 %v3964_v61 }
  0x4b   : > { %3703 = vmatmul.mubr.msk.f32.gmra.mrb[4].mxu0 %vm340_vm1, %v302_v12  ;;  %vm1125_vm2 = vcmp.ne.s32.totalorder %v829_v9, 0 }
  0x4c   : > { %3705 = vmatprep.mubr.msk.f32.mxu0 %vm340_vm1, %v303_v13 }
  0x4f   : > { %3706 = vmatmul.mubr.msk.f32.gmra.mrb[6].mxu0 %vm340_vm1, %v304_v14 }
  0x50   : > { %3708 = vmatprep.mubr.msk.f32.mxu0 %vm340_vm1, %v305_v15  ;;  %v699_v15 = vadd.s32 32, %v4476_v40 }
  0x53   : > { %3709 = vmatmul.mubr.msk.f32.gmra.mrb[8].mxu0 %vm340_vm1, %v306_v16  ;;  %v3373_v16 = vld [vmem:[%s5354_s3 + $0x28] sm:$0xff] }
  0x54   : > { %3711 = vmatprep.mubr.msk.f32.mxu0 %vm340_vm1, %v307_v17  ;;  %3748 = vmatprep.subr.mxu0 %v3373_v16 }
  0x55   : > { %3749 = vmatpush3.msra.mxu0 %v3373_v16  ;;  %3977 = vmatprep.subr.mxu1 %v3373_v16 }
  0x56   : > { %3979 = vmatpush3.msra.mxu1 %v3373_v16 }
  0x57   : > { %3712 = vmatmul.mubr.msk.f32.gmra.mrb[10].mxu0 %vm340_vm1, %v308_v18 }
  0x58   : > { %3714 = vmatprep.mubr.msk.f32.mxu0 %vm340_vm1, %v309_v19 }
  0x5b   : > { %3715 = vmatmul.mubr.msk.f32.gmra.mrb[12].mxu0 %vm340_vm1, %v310_v20  ;;  %v3357_v20 = vsel %vm4514_vm7, 1.0, %v4229_v0 }
  0x5c   : > { %3717 = vmatprep.mubr.msk.f32.mxu0 %vm340_vm1, %v311_v21 }
  0x5f   : > { %3718 = vmatmul.mubr.msk.f32.gmra.mrb[14].mxu0 %vm340_vm1, %v312_v22  ;;  %v706_v22 = vadd.s32 88, %v4476_v40 }
  0x60   : > { %3720 = vmatprep.mubr.msk.f32.mxu0 %vm340_vm1, %v313_v23 }
  0x63   : > { %3721 = vmatmul.mubr.msk.f32.gmra.mrb[16].mxu0 %vm340_vm1, %v314_v24  ;;  %v794_v24 = vand.u32 15, %v704_v11  ;;  %v714_v11 = vadd.s32 152, %v4476_v40 }
  0x64   : > { %3723 = vmatprep.mubr.msk.f32.mxu0 %vm340_vm1, %v315_v25  ;;  %v3340_v25 = vsel %vm4520_vm8, 1.0, %v4229_v0 }
  0x65   : > { %vm1216_vm10 = vcmp.ne.s32.totalorder %v794_v24, 15 }
  0x66   : > { %v3359_v44 = vsel %vm1216_vm10, 1.0, %v4229_v0 }
  0x67   : > { %3724 = vmatmul.mubr.msk.f32.gmra.mrb[18].mxu0 %vm340_vm1, %v316_v26 }
  0x68   : > { %3726 = vmatprep.mubr.msk.f32.mxu0 %vm340_vm1, %v317_v27 }
  0x6b   : > { %3727 = vmatmul.mubr.msk.f32.gmra.mrb[20].mxu0 %vm340_vm1, %v318_v28  ;;  %v759_v28 = vand.u32 15, %v699_v15 }
  0x6c   : > { %3729 = vmatprep.mubr.msk.f32.mxu0 %vm340_vm1, %v319_v29 }
  0x6d   : > { %vm1115_vm11 = vcmp.ne.s32.totalorder %v759_v28, 0 }
  0x6e   : > { %v3341_v49 = vsel %vm1115_vm11, 1.0, %v4229_v0 }
  0x6f   : > { %3730 = vmatmul.mubr.msk.f32.gmra.mrb[22].mxu0 %vm340_vm1, %v320_v30 }
  0x70   : > { %3732 = vmatprep.mubr.msk.f32.mxu0 %vm340_vm1, %v321_v31 }
  0x73   : > { %3733 = vmatmul.mubr.msk.f32.gmra.mrb[24].mxu0 %vm340_vm1, %v322_v32  ;;  %v3358_v32 = vsel %vm1214_vm9, 1.0, %v4229_v0 }
  0x74   : > { %3735 = vmatprep.mubr.msk.f32.mxu0 %vm340_vm1, %v323_v33 }
  0x77   : > { %3736 = vmatmul.mubr.msk.f32.gmra.mrb[26].mxu0 %vm340_vm1, %v324_v34 }
  0x78   : > { %3738 = vmatprep.mubr.msk.f32.mxu0 %vm340_vm1, %v325_v35  ;;  %v808_v35 = vand.u32 15, %v706_v22  ;;  %v716_v22 = vadd.s32 168, %v4476_v40 }
  0x7a   : > { %vm1218_vm12 = vcmp.ne.s32.totalorder %v808_v35, 15  ;;  %v878_v35 = vand.u32 15, %v716_v22 }
  0x7b   : > { %3739 = vmatmul.mubr.msk.f32.gmra.mrb[28].mxu0 %vm340_vm1, %v326_v36 }
  0x7c   : > { %3741 = vmatprep.mubr.msk.f32.mxu0 %vm340_vm1, %v327_v37  ;;  %v708_v37 = vadd.s32 104, %v4476_v40  ;;  %vm1228_vm6 = vcmp.ne.s32.totalorder %v878_v35, 15 }
  0x7f   : > { %3742 = vmatmul.mubr.msk.f32.gmra.mrb[30].mxu0 %vm340_vm1, %v328_v38 }
 0x116   : > { %v3698_v48 = vpop.f32.mrb[0].mxu0 }
 0x117   : > { %v509_v50 = vadd.f32 %v3698_v48, %v4484_v45  ;;  %v503_v52 = vpop.f32.mrb[1].mxu0  ;;  %v822_v48 = vand.u32 15, %v708_v37  ;;  %v718_v37 = vadd.s32 184, %v4476_v40 }
 0x118   : > { %v504_v53 = vadd.f32 %v4484_v45, %v503_v52 }
 0x119   : > { %v663_v58 = vmax.f32 %v509_v50, 0.0  ;;  %v710_v50 = vadd.s32 120, %v4476_v40  ;;  %vm1220_vm13 = vcmp.ne.s32.totalorder %v822_v48, 15 }
 0x11a   : > { %v662_v62 = vmax.f32 %v504_v53, 0.0  ;;  %v3701_v63 = vpop.f32.mrb[2].mxu0 }
 0x11b   : > { %v1314_v2 = vmul.f32 %v3355_v51, %v663_v58  ;;  %v519_v3 = vadd.f32 %v3701_v63, %v4484_v45  ;;  %1412 = vrot.lane.b32.xlu1 %v663_v58, %s4230_s23  ;;  %v513_v4 = vpop.f32.mrb[3].mxu0  ;;  %v711_v63 = vadd.s32 128, %v4476_v40 }
 0x11c   : > { %1346 = vst.msk [vmem:[#allocation2 + $0x19] sm:$0xff] %vm1345_vm5, %v662_v62  ;;  %v514_v6 = vadd.f32 %v4484_v45, %v513_v4  ;;  %v1539_v7 = vmul.f32 %v3339_v55, %v662_v62  ;;  %v3360_v55 = vsel %vm1218_vm12, 1.0, %v4229_v0 }
 0x11d   : > { %1347 = vst.msk [vmem:[#allocation2 + $0x21] sm:$0xff] %vm1345_vm5, %v1314_v2  ;;  %v4512_v8 = vmax.f32 %v519_v3, 0.0 }
 0x11e   : > { %v664_v12 = vmax.f32 %v514_v6, 0.0  ;;  %v3704_v13 = vpop.f32.mrb[4].mxu0  ;;  %1603 = vrot.lane.b32.xlu0 %v1539_v7, %s4231_s29  ;;  %v3361_v6 = vsel %vm1220_vm13, 1.0, %v4229_v0 }
 0x11f   : > { %v1316_v17 = vmul.f32 %v3356_v5, %v4512_v8  ;;  %v529_v18 = vadd.f32 %v3704_v13, %v4484_v45  ;;  %1605 = vrot.lane.b32.xlu1 %v663_v58, %s4231_s29  ;;  %v523_v19 = vpop.f32.mrb[5].mxu0 }
 0x120   : > { %1348 = vst.msk [vmem:[#allocation2 + $0x29] sm:$0xff] %vm1345_vm5, %v664_v12  ;;  %v524_v21 = vadd.f32 %v4484_v45, %v523_v19  ;;  %v1541_v34 = vmul.f32 %v3340_v25, %v664_v12 }
 0x121   : > { %1349 = vst.msk [vmem:[#allocation2 + $0x31] sm:$0xff] %vm1345_vm5, %v1316_v17  ;;  %v4538_v23 = vmax.f32 %v529_v18, 0.0 }
 0x122   : > { %v666_v26 = vmax.f32 %v524_v21, 0.0  ;;  %v3707_v27 = vpop.f32.mrb[6].mxu0  ;;  %1414 = vrot.lane.b32.xlu0 %v664_v12, %s4230_s23  ;;  %v843_v12 = vand.u32 15, %v711_v63  ;;  %v864_v21 = vand.u32 15, %v714_v11 }
 0x123   : > { %v1318_v29 = vmul.f32 %v3357_v20, %v4538_v23  ;;  %v539_v30 = vadd.f32 %v3707_v27, %v4484_v45  ;;  %v533_v31 = vpop.f32.mrb[7].mxu0  ;;  %1410 = vrot.lane.b32.xlu1 %v662_v62, %s4230_s23  ;;  %v836_v62 = vand.u32 15, %v710_v50 }
 0x124   : > { %1350 = vst.msk [vmem:[#allocation2 + $0x39] sm:$0xff] %vm1345_vm5, %v666_v26  ;;  %v534_v33 = vadd.f32 %v4484_v45, %v533_v31  ;;  %v1543_v58 = vmul.f32 %v3341_v49, %v666_v26  ;;  %vm1127_vm3 = vcmp.ne.s32.totalorder %v843_v12, 0  ;;  %vm1226_vm4 = vcmp.ne.s32.totalorder %v864_v21, 15 }
 0x125   : > { %1351 = vst.msk [vmem:[#allocation2 + $0x41] sm:$0xff] %vm1345_vm5, %v1318_v29  ;;  %v4551_v36 = vmax.f32 %v539_v30, 0.0  ;;  %vm1222_vm14 = vcmp.ne.s32.totalorder %v836_v62, 15  ;;  %v3346_v29 = vsel %vm1125_vm2, 1.0, %v4229_v0  ;;  %v3364_v48 = vsel %vm1226_vm4, 1.0, %v4229_v0 }
 0x126   : > { %v4554_v38 = vmax.f32 %v534_v33, 0.0  ;;  %v3710_v39 = vpop.f32.mrb[8].mxu0  ;;  %1607 = vrot.lane.b32.xlu0 %v1541_v34, %s4231_s29  ;;  %v3362_v18 = vsel %vm1222_vm14, 1.0, %v4229_v0  ;;  %v713_v33 = vadd.s32 144, %v4476_v40  ;;  %v3365_v62 = vsel %vm1228_vm6, 1.0, %v4229_v0 }
 0x127   : > { %v1320_v41 = vmul.f32 %v3358_v32, %v4551_v36  ;;  %v549_v42 = vadd.f32 %v3710_v39, %v4484_v45  ;;  %v543_v43 = vpop.f32.mrb[9].mxu0  ;;  %1416 = vrot.lane.b32.xlu1 %v4512_v8, %s4230_s23  ;;  %v3347_v32 = vsel %vm1127_vm3, 1.0, %v4229_v0 }
 0x128   : > { %1352 = vst.msk [vmem:[#allocation2 + $0x49] sm:$0xff] %vm1345_vm5, %v4554_v38  ;;  %v544_v46 = vadd.f32 %v4484_v45, %v543_v43 }
 0x129   : > { %1353 = vst.msk [vmem:[#allocation2 + $0x51] sm:$0xff] %vm1345_vm5, %v1320_v41  ;;  %v4566_v47 = vmax.f32 %v549_v42, 0.0 }
 0x12a   : > { %v4570_v51 = vmax.f32 %v544_v46, 0.0  ;;  %v3713_v52 = vpop.f32.mrb[10].mxu0  ;;  %1418 = vrot.lane.b32.xlu0 %v666_v26, %s4230_s23 }
 0x12b   : > { %v1322_v53 = vmul.f32 %v3359_v44, %v4566_v47  ;;  %v559_v54 = vadd.f32 %v3713_v52, %v4484_v45  ;;  %v553_v56 = vpop.f32.mrb[11].mxu0  ;;  %1609 = vrot.lane.b32.xlu1 %v4512_v8, %s4231_s29  ;;  %v850_v8 = vand.u32 15, %v712_v59  ;;  %v857_v52 = vand.u32 15, %v713_v33 }
 0x12c   : > { %1354 = vst.msk [vmem:[#allocation2 + $0x59] sm:$0xff] %vm1345_vm5, %v4570_v51  ;;  %v554_v57 = vadd.f32 %v4484_v45, %v553_v56 }
 0x12d   : > { %1355 = vst.msk [vmem:[#allocation2 + $0x61] sm:$0xff] %vm1345_vm5, %v1322_v53  ;;  %v4584_v61 = vmax.f32 %v559_v54, 0.0  ;;  %vm1224_vm15 = vcmp.ne.s32.totalorder %v850_v8, 15  ;;  %v892_v54 = vand.u32 15, %v718_v37  ;;  %vm1129_vm7 = vcmp.ne.s32.totalorder %v857_v52, 0 }
 0x12e   : > { %v4587_v1 = vmax.f32 %v554_v57, 0.0  ;;  %v3716_v2 = vpop.f32.mrb[12].mxu0  ;;  %1611 = vrot.lane.b32.xlu0 %v1543_v58, %s4231_s29  ;;  %v3363_v30 = vsel %vm1224_vm15, 1.0, %v4229_v0  ;;  %v3348_v9 = vsel %vm1129_vm7, 1.0, %v4229_v0 }
 0x12f   : > { %v1324_v3 = vmul.f32 %v3360_v55, %v4584_v61  ;;  %v569_v4 = vadd.f32 %v3716_v2, %v4484_v45  ;;  %v563_v5 = vpop.f32.mrb[13].mxu0  ;;  %v720_v55 = vadd.s32 200, %v4476_v40  ;;  %v715_v2 = vadd.s32 160, %v4476_v40 }
 0x130   : > { %1356 = vst.msk [vmem:[#allocation2 + $0x69] sm:$0xff] %vm1345_vm5, %v4587_v1  ;;  %v564_v7 = vadd.f32 %v4484_v45, %v563_v5  ;;  %vm1230_vm8 = vcmp.ne.s32.totalorder %v892_v54, 15  ;;  %v722_v5 = vadd.s32 216, %v4476_v40 }
 0x131   : > { %1357 = vst.msk [vmem:[#allocation2 + $0x71] sm:$0xff] %vm1345_vm5, %v1324_v3  ;;  %v4597_v10 = vmax.f32 %v569_v4, 0.0  ;;  %v906_v4 = vand.u32 15, %v720_v55 }
 0x132   : > { %v4600_v13 = vmax.f32 %v564_v7, 0.0  ;;  %v3719_v14 = vpop.f32.mrb[14].mxu0 }
 0x133   : > { %v1326_v15 = vmul.f32 %v3361_v6, %v4597_v10  ;;  %v579_v16 = vadd.f32 %v3719_v14, %v4484_v45  ;;  %v573_v17 = vpop.f32.mrb[15].mxu0  ;;  %1436 = vrot.lane.b32.xlu0 %v4597_v10, %s4230_s23  ;;  %v3366_v14 = vsel %vm1230_vm8, 1.0, %v4229_v0  ;;  %vm1232_vm9 = vcmp.ne.s32.totalorder %v906_v4, 15 }
 0x134   : > { %1358 = vst.msk [vmem:[#allocation2 + $0x79] sm:$0xff] %vm1345_vm5, %v4600_v13  ;;  %v574_v19 = vadd.f32 %v4484_v45, %v573_v17  ;;  %vm1506_vm8 = vcmask 130112  }
 0x135   : > { %1359 = vst.msk [vmem:[#allocation2 + $0x81] sm:$0xff] %vm1345_vm5, %v1326_v15  ;;  %v677_v20 = vmax.f32 %v579_v16, 0.0  ;;  %v871_v16 = vand.u32 15, %v715_v2 }
 0x136   : > { %v676_v24 = vmax.f32 %v574_v19, 0.0  ;;  %v3722_v25 = vpop.f32.mrb[16].mxu0  ;;  %v724_v19 = vadd.s32 232, %v4476_v40 }
 0x137   : > { %v1328_v26 = vmul.f32 %v3362_v18, %v677_v20  ;;  %v589_v27 = vadd.f32 %v3722_v25, %v4484_v45  ;;  %1440 = vrot.lane.b32.xlu1 %v677_v20, %s4230_s23  ;;  %v583_v28 = vpop.f32.mrb[17].mxu0  ;;  %v920_v18 = vand.u32 15, %v722_v5  ;;  %vm1131_vm10 = vcmp.ne.s32.totalorder %v871_v16, 0  ;;  %v1765_v16 = vld [vmem:[%s5354_s3 + $0x8] sm:$0xff] }
 0x138   : > { %1360 = vst.msk [vmem:[#allocation2 + $0x89] sm:$0xff] %vm1345_vm5, %v676_v24  ;;  %v584_v31 = vadd.f32 %v4484_v45, %v583_v28  ;;  %1438 = vrot.lane.b32.xlu0 %v676_v24, %s4230_s23  ;;  %v1553_v41 = vmul.f32 %v3346_v29, %v676_v24  ;;  %v717_v29 = vadd.s32 176, %v4476_v40  ;;  %v3349_v35 = vsel %vm1131_vm10, 1.0, %v4229_v0 }
 0x139   : > { %1361 = vst.msk [vmem:[#allocation2 + $0x91] sm:$0xff] %vm1345_vm5, %v1328_v26  ;;  %v679_v34 = vmax.f32 %v589_v27, 0.0  ;;  %v3367_v27 = vsel %vm1232_vm9, 1.0, %v4229_v0  ;;  %vm1234_vm11 = vcmp.ne.s32.totalorder %v920_v18, 15  ;;  %vm1699_vm10 = vcmask 195712  }
 0x13a   : > { %v678_v39 = vmax.f32 %v584_v31, 0.0  ;;  %v3725_v42 = vpop.f32.mrb[18].mxu0  ;;  %v934_v31 = vand.u32 15, %v724_v19 }
 0x13b   : > { %v1330_v43 = vmul.f32 %v3363_v30, %v679_v34  ;;  %1633 = vrot.lane.b32.xlu1 %v677_v20, %s4231_s29  ;;  %v599_v44 = vadd.f32 %v3725_v42, %v4484_v45  ;;  %v593_v46 = vpop.f32.mrb[19].mxu0  ;;  %v885_v42 = vand.u32 15, %v717_v29  ;;  %v701_v29 = vadd.s32 48, %v4476_v40 }
 0x13c   : > { %1362 = vst.msk [vmem:[#allocation2 + $0x99] sm:$0xff] %vm1345_vm5, %v678_v39  ;;  %1631 = vrot.lane.b32.xlu0 %v1553_v41, %s4231_s29  ;;  %v594_v49 = vadd.f32 %v4484_v45, %v593_v46  ;;  %v1555_v50 = vmul.f32 %v3347_v32, %v678_v39  ;;  %v726_v32 = vadd.s32 248, %v4476_v40  ;;  %vm1236_vm12 = vcmp.ne.s32.totalorder %v934_v31, 15 }
 0x13d   : > { %1363 = vst.msk [vmem:[#allocation2 + $0xa1] sm:$0xff] %vm1345_vm5, %v1330_v43  ;;  %v4630_v53 = vmax.f32 %v599_v44, 0.0  ;;  %v3368_v43 = vsel %vm1234_vm11, 1.0, %v4229_v0  ;;  %vm1133_vm13 = vcmp.ne.s32.totalorder %v885_v42, 0  ;;  %v773_v31 = vand.u32 15, %v701_v29 }
 0x13e   : > { %v680_v56 = vmax.f32 %v594_v49, 0.0  ;;  %v3728_v57 = vpop.f32.mrb[20].mxu0 }
 0x13f   : > { %v1332_v58 = vmul.f32 %v3364_v48, %v4630_v53  ;;  %1444 = vrot.lane.b32.xlu1 %v679_v34, %s4230_s23  ;;  %v609_v59 = vadd.f32 %v3728_v57, %v4484_v45  ;;  %v603_v60 = vpop.f32.mrb[21].mxu0  ;;  %v948_v48 = vand.u32 15, %v726_v32  ;;  %v719_v57 = vadd.s32 192, %v4476_v40 }
 0x140   : > { %1364 = vst.msk [vmem:[#allocation2 + $0xa9] sm:$0xff] %vm1345_vm5, %v680_v56  ;;  %1635 = vrot.lane.b32.xlu0 %v1555_v50, %s4231_s29  ;;  %v604_v63 = vadd.f32 %v4484_v45, %v603_v60  ;;  %v1557_v20 = vmul.f32 %v3348_v9, %v680_v56  ;;  %vm1117_vm6 = vcmp.ne.s32.totalorder %v773_v31, 0 }
 0x141   : > { %1365 = vst.msk [vmem:[#allocation2 + $0xb1] sm:$0xff] %vm1345_vm5, %v1332_v58  ;;  %v4642_v3 = vmax.f32 %v609_v59, 0.0  ;;  %v3369_v58 = vsel %vm1236_vm12, 1.0, %v4229_v0  ;;  %vm1238_vm14 = vcmp.ne.s32.totalorder %v948_v48, 15 }
 0x142   : > { %v682_v6 = vmax.f32 %v604_v63, 0.0  ;;  %v3731_v7 = vpop.f32.mrb[22].mxu0  ;;  %v3350_v63 = vsel %vm1133_vm13, 1.0, %v4229_v0 }
 0x143   : > { %1637 = vrot.lane.b32.xlu1 %v679_v34, %s4231_s29  ;;  %v1334_v8 = vmul.f32 %v3365_v62, %v4642_v3  ;;  %v619_v11 = vadd.f32 %v3731_v7, %v4484_v45  ;;  %v613_v12 = vpop.f32.mrb[23].mxu0  ;;  %v3370_v7 = vsel %vm1238_vm14, 1.0, %v4229_v0 }
 0x144   : > { %1446 = vrot.lane.b32.xlu0 %v680_v56, %s4230_s23  ;;  %1366 = vst.msk [vmem:[#allocation2 + $0xb9] sm:$0xff] %vm1345_vm5, %v682_v6  ;;  %v614_v15 = vadd.f32 %v4484_v45, %v613_v12  ;;  %v1559_v49 = vmul.f32 %v3349_v35, %v682_v6 }
 0x145   : > { %1367 = vst.msk [vmem:[#allocation2 + $0xc1] sm:$0xff] %vm1345_vm5, %v1334_v8  ;;  %v4654_v17 = vmax.f32 %v619_v11, 0.0 }
 0x146   : > { %v4657_v21 = vmax.f32 %v614_v15, 0.0  ;;  %v3734_v22 = vpop.f32.mrb[24].mxu0  ;;  %v721_v15 = vadd.s32 208, %v4476_v40 }
 0x147   : > { %1442 = vrot.lane.b32.xlu1 %v678_v39, %s4230_s23  ;;  %v1336_v24 = vmul.f32 %v3366_v14, %v4654_v17  ;;  %v629_v25 = vadd.f32 %v3734_v22, %v4484_v45  ;;  %v623_v26 = vpop.f32.mrb[25].mxu0 }
 0x148   : > { %1639 = vrot.lane.b32.xlu0 %v1557_v20, %s4231_s29  ;;  %1368 = vst.msk [vmem:[#allocation2 + $0xc9] sm:$0xff] %vm1345_vm5, %v4657_v21  ;;  %v624_v28 = vadd.f32 %v4484_v45, %v623_v26  ;;  %v1561_v11 = vmul.f32 %v3350_v63, %v4657_v21  ;;  %v913_v19 = vand.u32 15, %v721_v15  ;;  %v725_v26 = vadd.s32 240, %v4476_v40 }
 0x149   : > { %1369 = vst.msk [vmem:[#allocation2 + $0xd1] sm:$0xff] %vm1345_vm5, %v1336_v24  ;;  %v4669_v30 = vmax.f32 %v629_v25, 0.0 }
 0x14a   : > { %v4672_v33 = vmax.f32 %v624_v28, 0.0  ;;  %v3737_v34 = vpop.f32.mrb[26].mxu0  ;;  %vm1137_vm2 = vcmp.ne.s32.totalorder %v913_v19, 0  ;;  %v941_v28 = vand.u32 15, %v725_v26 }
 0x14b   : > { %1448 = vrot.lane.b32.xlu1 %v4630_v53, %s4230_s23  ;;  %v1338_v37 = vmul.f32 %v3367_v27, %v4669_v30  ;;  %v639_v39 = vadd.f32 %v3737_v34, %v4484_v45  ;;  %v633_v41 = vpop.f32.mrb[27].mxu0  ;;  %v3352_v22 = vsel %vm1137_vm2, 1.0, %v4229_v0  ;;  %v3342_v34 = vsel %vm1117_vm6, 1.0, %v4229_v0 }
 0x14c   : > { %1450 = vrot.lane.b32.xlu0 %v682_v6, %s4230_s23  ;;  %1370 = vst.msk [vmem:[#allocation2 + $0xd9] sm:$0xff] %vm1345_vm5, %v4672_v33  ;;  %v634_v44 = vadd.f32 %v4484_v45, %v633_v41  ;;  %v899_v6 = vand.u32 15, %v719_v57  ;;  %vm1141_vm4 = vcmp.ne.s32.totalorder %v941_v28, 0 }
 0x14d   : > { %1371 = vst.msk [vmem:[#allocation2 + $0xe1] sm:$0xff] %vm1345_vm5, %v1338_v37  ;;  %v4685_v46 = vmax.f32 %v639_v39, 0.0  ;;  %v1545_v37 = vmul.f32 %v3342_v34, %v4554_v38  ;;  %v705_v39 = vadd.s32 80, %v4476_v40 }
 0x14e   : > { %v688_v50 = vmax.f32 %v634_v44, 0.0  ;;  %v3740_v52 = vpop.f32.mrb[28].mxu0  ;;  %vm1135_vm15 = vcmp.ne.s32.totalorder %v899_v6, 0 }
 0x14f   : > { %1641 = vrot.lane.b32.xlu1 %v4630_v53, %s4231_s29  ;;  %v1340_v54 = vmul.f32 %v3368_v43, %v4685_v46  ;;  %v649_v55 = vadd.f32 %v3740_v52, %v4484_v45  ;;  %v643_v56 = vpop.f32.mrb[29].mxu0  ;;  %v801_v42 = vand.u32 15, %v705_v39 }
 0x150   : > { %1643 = vrot.lane.b32.xlu0 %v1559_v49, %s4231_s29  ;;  %1372 = vst.msk [vmem:[#allocation2 + $0xe9] sm:$0xff] %vm1345_vm5, %v688_v50  ;;  %v644_v59 = vadd.f32 %v4484_v45, %v643_v56  ;;  %v1565_v25 = vmul.f32 %v3352_v22, %v688_v50 }
 0x151   : > { %1373 = vst.msk [vmem:[#allocation2 + $0xf1] sm:$0xff] %vm1345_vm5, %v1340_v54  ;;  %v691_v60 = vmax.f32 %v649_v55, 0.0  ;;  %vm1121_vm9 = vcmp.ne.s32.totalorder %v801_v42, 0 }
 0x152   : > { %v690_v53 = vmax.f32 %v644_v59, 0.0  ;;  %v3743_v62 = vpop.f32.mrb[30].mxu0  ;;  %v3344_v44 = vsel %vm1121_vm9, 1.0, %v4229_v0 }
 0x153   : > { %1452 = vrot.lane.b32.xlu1 %v4642_v3, %s4230_s23  ;;  %v1342_v2 = vmul.f32 %v3369_v58, %v691_v60  ;;  %v659_v4 = vadd.f32 %v3743_v62, %v4484_v45  ;;  %v653_v5 = vpop.f32.mrb[31].mxu0  ;;  %v1549_v48 = vmul.f32 %v3344_v44, %v4587_v1 }
 0x154   : > { %1454 = vrot.lane.b32.xlu0 %v4657_v21, %s4230_s23  ;;  %1374 = vst.msk [vmem:[#allocation2 + $0xf9] sm:$0xff] %vm1345_vm5, %v690_v53  ;;  %v654_v8 = vadd.f32 %v4484_v45, %v653_v5  ;;  %v1764_v45 = vld [vmem:[%s5354_s3] sm:$0xff]  ;;  %v723_v21 = vadd.s32 224, %v4476_v40 }
 0x155   : > { %1375 = vst.msk [vmem:[#allocation2 + $0x101] sm:$0xff] %vm1345_vm5, %v1342_v2  ;;  %v693_v9 = vmax.f32 %v659_v4, 0.0  ;;  %v4723_v18 = vpack.c.bf16 %v1765_v16, %v1764_v45 }
 0x156   : > { %v692_v12 = vmax.f32 %v654_v8, 0.0  ;;  %v927_v24 = vand.u32 15, %v723_v21 }
 0x157   : > { %1645 = vrot.lane.b32.xlu1 %v4642_v3, %s4231_s29  ;;  %v1344_v14 = vmul.f32 %v3370_v7, %v693_v9  ;;  %v3351_v3 = vsel %vm1135_vm15, 1.0, %v4229_v0  ;;  %3969 = vmatprep.subr.bf16.mxu1 %v4723_v18 }
 0x158   : > { %1647 = vrot.lane.b32.xlu0 %v1561_v11, %s4231_s29  ;;  %1376 = vst.msk [vmem:[#allocation2 + $0x109] sm:$0xff] %vm1345_vm5, %v692_v12  ;;  %v1563_v20 = vmul.f32 %v3351_v3, %v4672_v33  ;;  %vm1139_vm3 = vcmp.ne.s32.totalorder %v927_v24, 0  ;;  %v3439_v3 = vld [vmem:[%s5354_s3 + $0x38] sm:$0xff] }
 0x159   : > { %1377 = vst.msk [vmem:[#allocation2 + $0x111] sm:$0xff] %vm1345_vm5, %v1344_v14  ;;  %v3438_v14 = vld [vmem:[%s5354_s3 + $0x30] sm:$0xff] }
 0x15b   : > { %1456 = vrot.lane.b32.xlu1 %v4654_v17, %s4230_s23 }
 0x15c   : > { %1458 = vrot.lane.b32.xlu0 %v4672_v33, %s4230_s23  ;;  %v703_v33 = vadd.s32 64, %v4476_v40 }
 0x15e   : > { %v787_v35 = vand.u32 15, %v703_v33 }
 0x15f   : > { %1649 = vrot.lane.b32.xlu1 %v4654_v17, %s4231_s29  ;;  %v3353_v17 = vsel %vm1139_vm3, 1.0, %v4229_v0 }
 0x160   : > { %1651 = vrot.lane.b32.xlu0 %v1563_v20, %s4231_s29  ;;  %v1567_v27 = vmul.f32 %v3353_v17, %v690_v53  ;;  %vm1119_vm7 = vcmp.ne.s32.totalorder %v787_v35, 0  ;;  %v4860_v20 = vpack.c.bf16 %v3439_v3, %v3438_v14 }
 0x161   : > { %v3343_v41 = vsel %vm1119_vm7, 1.0, %v4229_v0 }
 0x162   : > { %v1547_v43 = vmul.f32 %v3343_v41, %v4570_v51 }
 0x163   : > { %1460 = vrot.lane.b32.xlu1 %v4669_v30, %s4230_s23 }
 0x164   : > { %1462 = vrot.lane.b32.xlu0 %v688_v50, %s4230_s23 }
 0x167   : > { %1653 = vrot.lane.b32.xlu1 %v4669_v30, %s4231_s29  ;;  %v3354_v30 = vsel %vm1141_vm4, 1.0, %v4229_v0 }
 0x168   : > { %1655 = vrot.lane.b32.xlu0 %v1565_v25, %s4231_s29  ;;  %v1569_v32 = vmul.f32 %v3354_v30, %v692_v12 }
 0x16b   : > { %1464 = vrot.lane.b32.xlu1 %v4685_v46, %s4230_s23 }
 0x16c   : > { %1466 = vrot.lane.b32.xlu0 %v690_v53, %s4230_s23 }
 0x16f   : > { %1657 = vrot.lane.b32.xlu1 %v4685_v46, %s4231_s29 }
 0x170   : > { %1659 = vrot.lane.b32.xlu0 %v1567_v27, %s4231_s29 }
 0x173   : > { %1468 = vrot.lane.b32.xlu1 %v691_v60, %s4230_s23 }
 0x174   : > { %1665 = vrot.lane.b32.xlu0 %v693_v9, %s4231_s29 }
 0x177   : > { %1661 = vrot.lane.b32.xlu1 %v691_v60, %s4231_s29 }
 0x178   : > { %1470 = vrot.lane.b32.xlu0 %v692_v12, %s4230_s23  ;;  %v1766_v12 = vld [vmem:[%s5354_s3 + $0x10] sm:$0xff] }
 0x17b   : > { %1472 = vrot.lane.b32.xlu1 %v693_v9, %s4230_s23 }
 0x17c   : > { %1663 = vrot.lane.b32.xlu0 %v1569_v32, %s4231_s29 }
 0x17f   : > { %1420 = vrot.lane.b32.xlu1 %v4538_v23, %s4230_s23 }
 0x180   : > { %1422 = vrot.lane.b32.xlu0 %v4554_v38, %s4230_s23 }
 0x183   : > { %1613 = vrot.lane.b32.xlu1 %v4538_v23, %s4231_s29  ;;  %v707_v23 = vadd.s32 96, %v4476_v40 }
 0x184   : > { %1615 = vrot.lane.b32.xlu0 %v1545_v37, %s4231_s29 }
 0x185   : > { %v815_v46 = vand.u32 15, %v707_v23 }
 0x187   : > { %1424 = vrot.lane.b32.xlu1 %v4551_v36, %s4230_s23  ;;  %vm1123_vm11 = vcmp.ne.s32.totalorder %v815_v46, 0 }
 0x188   : > { %1426 = vrot.lane.b32.xlu0 %v4570_v51, %s4230_s23 }
 0x18b   : > { %1617 = vrot.lane.b32.xlu1 %v4551_v36, %s4231_s29 }
 0x18c   : > { %1619 = vrot.lane.b32.xlu0 %v1547_v43, %s4231_s29 }
 0x18d   : > { %v1413_v38 = vpop.permute.xlu1 %1412 }
 0x18e   : > { %1508 = vst.msk [vmem:[#allocation2 + $0x20] sm:$0xff] %vm1506_vm8, %v1413_v38 }
 0x18f   : > { %1428 = vrot.lane.b32.xlu1 %v4566_v47, %s4230_s23 }
 0x190   : > { %1430 = vrot.lane.b32.xlu0 %v4587_v1, %s4230_s23  ;;  %v1604_v51 = vpop.permute.xlu0 %1603  ;;  %v3345_v1 = vsel %vm1123_vm11, 1.0, %v4229_v0 }
 0x191   : > { %v1606_v36 = vpop.permute.xlu1 %1605  ;;  %v1551_v52 = vmul.f32 %v3345_v1, %v4600_v13 }
 0x193   : > { %1621 = vrot.lane.b32.xlu1 %v4566_v47, %s4231_s29 }
 0x194   : > { %1623 = vrot.lane.b32.xlu0 %v1549_v48, %s4231_s29  ;;  %v1415_v40 = vpop.permute.xlu0 %1414 }
 0x195   : > { %1509 = vst.msk [vmem:[#allocation2 + $0x28] sm:$0xff] %vm1506_vm8, %v1415_v40  ;;  %v1411_v49 = vpop.permute.xlu1 %1410 }
 0x196   : > { %1507 = vst.msk [vmem:[#allocation2 + $0x18] sm:$0xff] %vm1506_vm8, %v1411_v49 }
 0x197   : > { %1700 = vst.msk [vmem:[#allocation2 + $0x17] sm:$0xff] %vm1699_vm10, %v1604_v51  ;;  %1701 = vst.msk [vmem:[#allocation2 + $0x1f] sm:$0xff] %vm1699_vm10, %v1606_v36  ;;  %1432 = vrot.lane.b32.xlu1 %v4584_v61, %s4230_s23 }
 0x198   : > { %1434 = vrot.lane.b32.xlu0 %v4600_v13, %s4230_s23  ;;  %v1608_v47 = vpop.permute.xlu0 %1607 }
 0x199   : > { %1702 = vst.msk [vmem:[#allocation2 + $0x27] sm:$0xff] %vm1699_vm10, %v1608_v47  ;;  %v1417_v50 = vpop.permute.xlu1 %1416 }
 0x19a   : > { %1510 = vst.msk [vmem:[#allocation2 + $0x30] sm:$0xff] %vm1506_vm8, %v1417_v50 }
 0x19b   : > { %1625 = vrot.lane.b32.xlu1 %v4584_v61, %s4231_s29 }
 0x19c   : > { %1627 = vrot.lane.b32.xlu0 %v1551_v52, %s4231_s29  ;;  %v1419_v54 = vpop.permute.xlu0 %1418 }
 0x19d   : > { %1511 = vst.msk [vmem:[#allocation2 + $0x38] sm:$0xff] %vm1506_vm8, %v1419_v54  ;;  %v1610_v0 = vpop.permute.xlu1 %1609 }
 0x19e   : > { %1703 = vst.msk [vmem:[#allocation2 + $0x2f] sm:$0xff] %vm1699_vm10, %v1610_v0  ;;  %v4804_v55 = vld [vmem:[#allocation2 + $0x18] sm:$0xff] }
 0x19f   : > { %1629 = vrot.lane.b32.xlu1 %v4597_v10, %s4231_s29  ;;  %3750 = vmatprep.mubr.msk.f32.mxu0 %vm1303_vm0, %v4804_v55 }
 0x1a0   : > { %v1612_v13 = vpop.permute.xlu0 %1611  ;;  %v4810_v56 = vld [vmem:[#allocation2 + $0x20] sm:$0xff] }
 0x1a1   : > { %1704 = vst.msk [vmem:[#allocation2 + $0x37] sm:$0xff] %vm1699_vm10, %v1612_v13  ;;  %3751 = vmatmul.mubr.msk.f32.vlgmr.msra.gmra.mrb[32].mxu0 %vm1303_vm0, %v4810_v56 }
 0x1a5   : > { %v1437_v61 = vpop.permute.xlu0 %1436  ;;  %v4815_v57 = vld [vmem:[#allocation2 + $0x28] sm:$0xff] }
 0x1a6   : > { %1520 = vst.msk [vmem:[#allocation2 + $0x80] sm:$0xff] %vm1506_vm8, %v1437_v61  ;;  %3753 = vmatprep.mubr.msk.f32.mxu0 %vm1303_vm0, %v4815_v57 }
 0x1a8   : > { %v4820_v10 = vld [vmem:[#allocation2 + $0x30] sm:$0xff] }
 0x1a9   : > { %v1441_v58 = vpop.permute.xlu1 %1440  ;;  %3754 = vmatmul.mubr.msk.f32.gmra.mrb[34].mxu0 %vm1303_vm0, %v4820_v10 }
 0x1aa   : > { %1522 = vst.msk [vmem:[#allocation2 + $0x90] sm:$0xff] %vm1506_vm8, %v1441_v58  ;;  %v1439_v59 = vpop.permute.xlu0 %1438 }
 0x1ab   : > { %1521 = vst.msk [vmem:[#allocation2 + $0x88] sm:$0xff] %vm1506_vm8, %v1439_v59 }
 0x1ad   : > { %v1634_v60 = vpop.permute.xlu1 %1633 }
 0x1ae   : > { %1715 = vst.msk [vmem:[#allocation2 + $0x8f] sm:$0xff] %vm1699_vm10, %v1634_v60  ;;  %v1632_v53 = vpop.permute.xlu0 %1631  ;;  %v1732_v60 = vld [vmem:[#allocation2 + $0x8] sm:$0xff] }
 0x1af   : > { %1714 = vst.msk [vmem:[#allocation2 + $0x87] sm:$0xff] %vm1699_vm10, %v1632_v53 }
 0x1b1   : > { %v1445_v62 = vpop.permute.xlu1 %1444 }
 0x1b2   : > { %1524 = vst.msk [vmem:[#allocation2 + $0xa0] sm:$0xff] %vm1506_vm8, %v1445_v62  ;;  %v1636_v63 = vpop.permute.xlu0 %1635 }
 0x1b5   : > { %v1638_v2 = vpop.permute.xlu1 %1637 }
 0x1b6   : > { %v1447_v4 = vpop.permute.xlu0 %1446  ;;  %v4829_v5 = vld [vmem:[#allocation2 + $0x88] sm:$0xff] }
 0x1b7   : > { %1525 = vst.msk [vmem:[#allocation2 + $0xa8] sm:$0xff] %vm1506_vm8, %v1447_v4  ;;  %3771 = vmatprep.mubr.msk.f32.mxu1 %vm1303_vm0, %v4829_v5 }
 0x1b9   : > { %v1443_v6 = vpop.permute.xlu1 %1442 }
 0x1ba   : > { %1523 = vst.msk [vmem:[#allocation2 + $0x98] sm:$0xff] %vm1506_vm8, %v1443_v6  ;;  %v1640_v7 = vpop.permute.xlu0 %1639 }
 0x1bb   : > { %1716 = vst.msk [vmem:[#allocation2 + $0x97] sm:$0xff] %vm1699_vm10, %v1636_v63  ;;  %1717 = vst.msk [vmem:[#allocation2 + $0x9f] sm:$0xff] %vm1699_vm10, %v1638_v2 }
 0x1bc   : > { %1718 = vst.msk [vmem:[#allocation2 + $0xa7] sm:$0xff] %vm1699_vm10, %v1640_v7  ;;  %v1733_v7 = vld [vmem:[#allocation2 + $0x10] sm:$0xff] }
 0x1bd   : > { %v1449_v8 = vpop.permute.xlu1 %1448 }
 0x1be   : > { %1526 = vst.msk [vmem:[#allocation2 + $0xb0] sm:$0xff] %vm1506_vm8, %v1449_v8  ;;  %v1451_v9 = vpop.permute.xlu0 %1450  ;;  %v3440_v8 = vld [vmem:[%s5354_s3 + $0x40] sm:$0xff] }
 0x1bf   : > { %1527 = vst.msk [vmem:[#allocation2 + $0xb8] sm:$0xff] %vm1506_vm8, %v1451_v9 }
 0x1c1   : > { %v1642_v11 = vpop.permute.xlu1 %1641 }
 0x1c2   : > { %1719 = vst.msk [vmem:[#allocation2 + $0xaf] sm:$0xff] %vm1699_vm10, %v1642_v11  ;;  %v1644_v15 = vpop.permute.xlu0 %1643  ;;  %v4847_v45 = vld [vmem:[#allocation2 + $0x90] sm:$0xff]  ;;  %v4849_v16 = vld [vmem:[#allocation2 + $0x98] sm:$0xff] }
 0x1c3   : > { %1720 = vst.msk [vmem:[#allocation2 + $0xb7] sm:$0xff] %vm1699_vm10, %v1644_v15  ;;  %3772 = vmatmul.mubr.msk.f32.vlgmr.msra.gmra.mrb[0].mxu1 %vm1303_vm0, %v4847_v45  ;;  %v4863_v22 = vld [vmem:[#allocation2 + $0xa0] sm:$0xff] }
 0x1c4   : > { %3774 = vmatprep.mubr.msk.f32.mxu1 %vm1303_vm0, %v4849_v16  ;;  %3971 = vmatpush3.bf16.msra.mxu1 %v4723_v18 }
 0x1c5   : > { %v1453_v19 = vpop.permute.xlu1 %1452  ;;  %3802 = vmatprep.subr.mxu1 %v1766_v12 }
 0x1c6   : > { %1528 = vst.msk [vmem:[#allocation2 + $0xc0] sm:$0xff] %vm1506_vm8, %v1453_v19  ;;  %v1455_v21 = vpop.permute.xlu0 %1454 }
 0x1c7   : > { %1529 = vst.msk [vmem:[#allocation2 + $0xc8] sm:$0xff] %vm1506_vm8, %v1455_v21  ;;  %3775 = vmatmul.mubr.msk.f32.gmra.mrb[2].mxu1 %vm1303_vm0, %v4863_v22 }
 0x1c8   : > { %3803 = vmatpush3.msra.mxu1 %v1766_v12 }
 0x1c9   : > { %v1646_v24 = vpop.permute.xlu1 %1645  ;;  %v4868_v25 = vld [vmem:[#allocation2 + $0xa8] sm:$0xff]  ;;  %3973 = vmatprep.subr.bf16.mxu1 %v4860_v20 }
 0x1ca   : > { %1721 = vst.msk [vmem:[#allocation2 + $0xbf] sm:$0xff] %vm1699_vm10, %v1646_v24  ;;  %3777 = vmatprep.mubr.msk.f32.mxu1 %vm1303_vm0, %v4868_v25  ;;  %v1648_v18 = vpop.permute.xlu0 %1647  ;;  %v4874_v17 = vld [vmem:[#allocation2 + $0xb0] sm:$0xff] }
 0x1cb   : > { %1722 = vst.msk [vmem:[#allocation2 + $0xc7] sm:$0xff] %vm1699_vm10, %v1648_v18  ;;  %3778 = vmatmul.mubr.msk.f32.gmra.mrb[4].mxu1 %vm1303_vm0, %v4874_v17 }
 0x1cd   : > { %v1457_v26 = vpop.permute.xlu1 %1456 }
 0x1ce   : > { %1530 = vst.msk [vmem:[#allocation2 + $0xd0] sm:$0xff] %vm1506_vm8, %v1457_v26  ;;  %v1459_v27 = vpop.permute.xlu0 %1458 }
 0x1cf   : > { %1531 = vst.msk [vmem:[#allocation2 + $0xd8] sm:$0xff] %vm1506_vm8, %v1459_v27 }
 0x1d1   : > { %v1650_v28 = vpop.permute.xlu1 %1649  ;;  %v4881_v29 = vld [vmem:[#allocation2 + $0xb8] sm:$0xff] }
 0x1d2   : > { %1723 = vst.msk [vmem:[#allocation2 + $0xcf] sm:$0xff] %vm1699_vm10, %v1650_v28  ;;  %3780 = vmatprep.mubr.msk.f32.mxu1 %vm1303_vm0, %v4881_v29  ;;  %v1652_v30 = vpop.permute.xlu0 %1651  ;;  %v4886_v31 = vld [vmem:[#allocation2 + $0xc0] sm:$0xff] }
 0x1d3   : > { %1724 = vst.msk [vmem:[#allocation2 + $0xd7] sm:$0xff] %vm1699_vm10, %v1652_v30  ;;  %3781 = vmatmul.mubr.msk.f32.gmra.mrb[6].mxu1 %vm1303_vm0, %v4886_v31 }
 0x1d5   : > { %v1461_v32 = vpop.permute.xlu1 %1460 }
 0x1d6   : > { %1532 = vst.msk [vmem:[#allocation2 + $0xe0] sm:$0xff] %vm1506_vm8, %v1461_v32  ;;  %v1463_v33 = vpop.permute.xlu0 %1462 }
 0x1d7   : > { %1533 = vst.msk [vmem:[#allocation2 + $0xe8] sm:$0xff] %vm1506_vm8, %v1463_v33 }
 0x1d9   : > { %v1654_v34 = vpop.permute.xlu1 %1653  ;;  %v4893_v35 = vld [vmem:[#allocation2 + $0xc8] sm:$0xff] }
 0x1da   : > { %1725 = vst.msk [vmem:[#allocation2 + $0xdf] sm:$0xff] %vm1699_vm10, %v1654_v34  ;;  %3783 = vmatprep.mubr.msk.f32.mxu1 %vm1303_vm0, %v4893_v35  ;;  %v1656_v37 = vpop.permute.xlu0 %1655  ;;  %v4898_v39 = vld [vmem:[#allocation2 + $0xd0] sm:$0xff] }
 0x1db   : > { %1726 = vst.msk [vmem:[#allocation2 + $0xe7] sm:$0xff] %vm1699_vm10, %v1656_v37  ;;  %3784 = vmatmul.mubr.msk.f32.gmra.mrb[8].mxu1 %vm1303_vm0, %v4898_v39 }
 0x1dd   : > { %v1465_v41 = vpop.permute.xlu1 %1464 }
 0x1de   : > { %1534 = vst.msk [vmem:[#allocation2 + $0xf0] sm:$0xff] %vm1506_vm8, %v1465_v41  ;;  %v1467_v42 = vpop.permute.xlu0 %1466 }
 0x1df   : > { %1535 = vst.msk [vmem:[#allocation2 + $0xf8] sm:$0xff] %vm1506_vm8, %v1467_v42 }
 0x1e1   : > { %v1658_v43 = vpop.permute.xlu1 %1657  ;;  %v4905_v23 = vld [vmem:[#allocation2 + $0xd8] sm:$0xff] }
 0x1e2   : > { %1727 = vst.msk [vmem:[#allocation2 + $0xef] sm:$0xff] %vm1699_vm10, %v1658_v43  ;;  %3786 = vmatprep.mubr.msk.f32.mxu1 %vm1303_vm0, %v4905_v23  ;;  %v1660_v38 = vpop.permute.xlu0 %1659  ;;  %v4910_v44 = vld [vmem:[#allocation2 + $0xe0] sm:$0xff] }
 0x1e3   : > { %1728 = vst.msk [vmem:[#allocation2 + $0xf7] sm:$0xff] %vm1699_vm10, %v1660_v38  ;;  %3787 = vmatmul.mubr.msk.f32.gmra.mrb[10].mxu1 %vm1303_vm0, %v4910_v44  ;;  %v5096_v43 = vld [vmem:[%s5355_s4] ss:$0 sm:$0xff] }
 0x1e5   : > { %v1469_v51 = vpop.permute.xlu1 %1468 }
 0x1e6   : > { %1536 = vst.msk [vmem:[#allocation2 + $0x100] sm:$0xff] %vm1506_vm8, %v1469_v51  ;;  %v1666_v46 = vpop.permute.xlu0 %1665 }
 0x1e9   : > { %v1662_v36 = vpop.permute.xlu1 %1661  ;;  %v4916_v48 = vld [vmem:[#allocation2 + $0xe8] sm:$0xff] }
 0x1ea   : > { %1729 = vst.msk [vmem:[#allocation2 + $0xff] sm:$0xff] %vm1699_vm10, %v1662_v36  ;;  %3789 = vmatprep.mubr.msk.f32.mxu1 %vm1303_vm0, %v4916_v48  ;;  %v1471_v40 = vpop.permute.xlu0 %1470  ;;  %v4921_v49 = vld [vmem:[#allocation2 + $0xf0] sm:$0xff] }
 0x1eb   : > { %1537 = vst.msk [vmem:[#allocation2 + $0x108] sm:$0xff] %vm1506_vm8, %v1471_v40  ;;  %3790 = vmatmul.mubr.msk.f32.gmra.mrb[12].mxu1 %vm1303_vm0, %v4921_v49 }
 0x1ed   : > { %v1473_v1 = vpop.permute.xlu1 %1472 }
 0x1ee   : > { %1538 = vst.msk [vmem:[#allocation2 + $0x110] sm:$0xff] %vm1506_vm8, %v1473_v1  ;;  %v1664_v47 = vpop.permute.xlu0 %1663 }
 0x1ef   : > { %1731 = vst.msk [vmem:[#allocation2 + $0x10f] sm:$0xff] %vm1699_vm10, %v1666_v46  ;;  %1730 = vst.msk [vmem:[#allocation2 + $0x107] sm:$0xff] %vm1699_vm10, %v1664_v47 }
 0x1f1   : > { %v1421_v50 = vpop.permute.xlu1 %1420  ;;  %v4929_v52 = vld [vmem:[#allocation2 + $0xf8] sm:$0xff] }
 0x1f2   : > { %1512 = vst.msk [vmem:[#allocation2 + $0x40] sm:$0xff] %vm1506_vm8, %v1421_v50  ;;  %3792 = vmatprep.mubr.msk.f32.mxu1 %vm1303_vm0, %v4929_v52  ;;  %v1423_v54 = vpop.permute.xlu0 %1422 }
 0x1f3   : > { %1513 = vst.msk [vmem:[#allocation2 + $0x48] sm:$0xff] %vm1506_vm8, %v1423_v54 }
 0x1f5   : > { %v1614_v0 = vpop.permute.xlu1 %1613 }
 0x1f6   : > { %1705 = vst.msk [vmem:[#allocation2 + $0x3f] sm:$0xff] %vm1699_vm10, %v1614_v0  ;;  %v1616_v13 = vpop.permute.xlu0 %1615  ;;  %v4936_v61 = vld [vmem:[#allocation2 + $0x100] sm:$0xff]  ;;  %v4938_v58 = vld [vmem:[#allocation2 + $0x108] sm:$0xff]  ;;  %v4946_v62 = vld [vmem:[#allocation2 + $0x110] sm:$0xff] }
 0x1f7   : > { %1706 = vst.msk [vmem:[#allocation2 + $0x47] sm:$0xff] %vm1699_vm10, %v1616_v13  ;;  %3793 = vmatmul.mubr.msk.f32.gmra.mrb[14].mxu1 %vm1303_vm0, %v4936_v61 }
 0x1f8   : > { %3795 = vmatprep.mubr.msk.f32.mxu1 %vm1303_vm0, %v4938_v58 }
 0x1f9   : > { %v1425_v59 = vpop.permute.xlu1 %1424 }
 0x1fa   : > { %1514 = vst.msk [vmem:[#allocation2 + $0x50] sm:$0xff] %vm1506_vm8, %v1425_v59  ;;  %v1427_v53 = vpop.permute.xlu0 %1426 }
 0x1fb   : > { %1515 = vst.msk [vmem:[#allocation2 + $0x58] sm:$0xff] %vm1506_vm8, %v1427_v53  ;;  %3796 = vmatmul.mubr.msk.f32.gmra.mrb[16].mxu1 %vm1303_vm0, %v4946_v62 }
 0x1fc   : > { %3804 = vmatprep.mubr.msk.f32.mxu1 %vm1303_vm0, %v1732_v60 }
 0x1fd   : > { %v1618_v63 = vpop.permute.xlu1 %1617  ;;  %v4952_v2 = vld [vmem:[#allocation2 + $0x38] sm:$0xff] }
 0x1fe   : > { %1707 = vst.msk [vmem:[#allocation2 + $0x4f] sm:$0xff] %vm1699_vm10, %v1618_v63  ;;  %v1620_v4 = vpop.permute.xlu0 %1619  ;;  %3756 = vmatprep.mubr.msk.f32.mxu0 %vm1303_vm0, %v4952_v2  ;;  %v4957_v6 = vld [vmem:[#allocation2 + $0x40] sm:$0xff] }
 0x1ff   : > { %1708 = vst.msk [vmem:[#allocation2 + $0x57] sm:$0xff] %vm1699_vm10, %v1620_v4  ;;  %3757 = vmatmul.mubr.msk.f32.gmra.mrb[36].mxu0 %vm1303_vm0, %v4957_v6  ;;  %3805 = vmatmul.mubr.msk.f32.vlgmr.msra.gmra.mrb[18].mxu1 %vm1303_vm0, %v1733_v7 }
 0x200   : > { %3975 = vmatpush3.bf16.msra.mxu1 %v4860_v20  ;;  %3807 = vmatprep.mubr.msk.f32.mxu1 %vm1303_vm0, %v4804_v55 }
 0x201   : > { %v1429_v9 = vpop.permute.xlu1 %1428  ;;  %3856 = vmatprep.subr.mxu1 %v3440_v8 }
 0x202   : > { %1516 = vst.msk [vmem:[#allocation2 + $0x60] sm:$0xff] %vm1506_vm8, %v1429_v9  ;;  %v1431_v11 = vpop.permute.xlu0 %1430 }
 0x203   : > { %1517 = vst.msk [vmem:[#allocation2 + $0x68] sm:$0xff] %vm1506_vm8, %v1431_v11  ;;  %3808 = vmatmul.mubr.msk.f32.gmra.mrb[20].mxu1 %vm1303_vm0, %v4810_v56 }
 0x204   : > { %3810 = vmatprep.mubr.msk.f32.mxu1 %vm1303_vm0, %v4815_v57  ;;  %3857 = vmatpush3.msra.mxu1 %v3440_v8 }
 0x205   : > { %v1622_v12 = vpop.permute.xlu1 %1621  ;;  %v1740_v14 = vld [vmem:[#allocation2 + $0x48] sm:$0xff] }
 0x206   : > { %1709 = vst.msk [vmem:[#allocation2 + $0x5f] sm:$0xff] %vm1699_vm10, %v1622_v12  ;;  %v1624_v15 = vpop.permute.xlu0 %1623  ;;  %3759 = vmatprep.mubr.msk.f32.mxu0 %vm1303_vm0, %v1740_v14  ;;  %v1741_v55 = vld [vmem:[#allocation2 + $0x50] sm:$0xff] }
 0x207   : > { %1710 = vst.msk [vmem:[#allocation2 + $0x67] sm:$0xff] %vm1699_vm10, %v1624_v15  ;;  %3760 = vmatmul.mubr.msk.f32.gmra.mrb[38].mxu0 %vm1303_vm0, %v1741_v55  ;;  %3811 = vmatmul.mubr.msk.f32.gmra.mrb[22].mxu1 %vm1303_vm0, %v4820_v10 }
 0x208   : > { %3813 = vmatprep.mubr.msk.f32.mxu1 %vm1303_vm0, %v4952_v2 }
 0x209   : > { %v1433_v56 = vpop.permute.xlu1 %1432 }
 0x20a   : > { %1518 = vst.msk [vmem:[#allocation2 + $0x70] sm:$0xff] %vm1506_vm8, %v1433_v56  ;;  %v1435_v3 = vpop.permute.xlu0 %1434 }
 0x20b   : > { %1519 = vst.msk [vmem:[#allocation2 + $0x78] sm:$0xff] %vm1506_vm8, %v1435_v3  ;;  %3814 = vmatmul.mubr.msk.f32.gmra.mrb[24].mxu1 %vm1303_vm0, %v4957_v6 }
 0x20c   : > { %3816 = vmatprep.mubr.msk.f32.mxu1 %vm1303_vm0, %v1740_v14 }
 0x20d   : > { %v1626_v19 = vpop.permute.xlu1 %1625  ;;  %v1742_v20 = vld [vmem:[#allocation2 + $0x58] sm:$0xff] }
 0x20e   : > { %1711 = vst.msk [vmem:[#allocation2 + $0x6f] sm:$0xff] %vm1699_vm10, %v1626_v19  ;;  %v1628_v21 = vpop.permute.xlu0 %1627  ;;  %3762 = vmatprep.mubr.msk.f32.mxu0 %vm1303_vm0, %v1742_v20  ;;  %v1743_v24 = vld [vmem:[#allocation2 + $0x60] sm:$0xff] }
 0x20f   : > { %1712 = vst.msk [vmem:[#allocation2 + $0x77] sm:$0xff] %vm1699_vm10, %v1628_v21  ;;  %3763 = vmatmul.mubr.msk.f32.gmra.mrb[40].mxu0 %vm1303_vm0, %v1743_v24  ;;  %3817 = vmatmul.mubr.msk.f32.gmra.mrb[26].mxu1 %vm1303_vm0, %v1741_v55 }
 0x210   : > { %3819 = vmatprep.mubr.msk.f32.mxu1 %vm1303_vm0, %v1742_v20 }
 0x211   : > { %v1630_v18 = vpop.permute.xlu1 %1629 }
 0x212   : > { %1713 = vst.msk [vmem:[#allocation2 + $0x7f] sm:$0xff] %vm1699_vm10, %v1630_v18 }
 0x213   : > { %3820 = vmatmul.mubr.msk.f32.gmra.mrb[28].mxu1 %vm1303_vm0, %v1743_v24 }
 0x215   : > { %v1744_v26 = vld [vmem:[#allocation2 + $0x68] sm:$0xff] }
 0x216   : > { %3765 = vmatprep.mubr.msk.f32.mxu0 %vm1303_vm0, %v1744_v26  ;;  %3822 = vmatprep.mubr.msk.f32.mxu1 %vm1303_vm0, %v1744_v26  ;;  %v1745_v27 = vld [vmem:[#allocation2 + $0x70] sm:$0xff] }
 0x217   : > { %3766 = vmatmul.mubr.msk.f32.gmra.mrb[42].mxu0 %vm1303_vm0, %v1745_v27  ;;  %3823 = vmatmul.mubr.msk.f32.gmra.mrb[30].mxu1 %vm1303_vm0, %v1745_v27 }
 0x219   : > { %v1746_v28 = vld [vmem:[#allocation2 + $0x78] sm:$0xff]  ;;  %v1747_v30 = vld [vmem:[#allocation2 + $0x80] sm:$0xff] }
 0x21a   : > { %3768 = vmatprep.mubr.msk.f32.mxu0 %vm1303_vm0, %v1746_v28  ;;  %3825 = vmatprep.mubr.msk.f32.mxu1 %vm1303_vm0, %v1746_v28 }
 0x21b   : > { %3769 = vmatmul.mubr.msk.f32.gmra.mrb[44].mxu0 %vm1303_vm0, %v1747_v30  ;;  %3826 = vmatmul.mubr.msk.f32.gmra.mrb[0].mxu1 %vm1303_vm0, %v1747_v30 }
 0x21c   : > { %3828 = vmatprep.mubr.msk.f32.mxu1 %vm1303_vm0, %v4829_v5 }
 0x21f   : > { %3829 = vmatmul.mubr.msk.f32.gmra.mrb[2].mxu1 %vm1303_vm0, %v4847_v45 }
 0x220   : > { %3831 = vmatprep.mubr.msk.f32.mxu1 %vm1303_vm0, %v4849_v16 }
 0x223   : > { %3832 = vmatmul.mubr.msk.f32.gmra.mrb[4].mxu1 %vm1303_vm0, %v4863_v22 }
 0x224   : > { %3834 = vmatprep.mubr.msk.f32.mxu1 %vm1303_vm0, %v4868_v25 }
 0x227   : > { %3835 = vmatmul.mubr.msk.f32.gmra.mrb[6].mxu1 %vm1303_vm0, %v4874_v17 }
 0x228   : > { %3837 = vmatprep.mubr.msk.f32.mxu1 %vm1303_vm0, %v4881_v29 }
 0x22b   : > { %3838 = vmatmul.mubr.msk.f32.gmra.mrb[8].mxu1 %vm1303_vm0, %v4886_v31 }
 0x22c   : > { %3840 = vmatprep.mubr.msk.f32.mxu1 %vm1303_vm0, %v4893_v35 }
 0x22f   : > { %3841 = vmatmul.mubr.msk.f32.gmra.mrb[10].mxu1 %vm1303_vm0, %v4898_v39 }
 0x230   : > { %3843 = vmatprep.mubr.msk.f32.mxu1 %vm1303_vm0, %v4905_v23 }
 0x233   : > { %3844 = vmatmul.mubr.msk.f32.gmra.mrb[12].mxu1 %vm1303_vm0, %v4910_v44 }
 0x234   : > { %3846 = vmatprep.mubr.msk.f32.mxu1 %vm1303_vm0, %v4916_v48 }
 0x237   : > { %3847 = vmatmul.mubr.msk.f32.gmra.mrb[14].mxu1 %vm1303_vm0, %v4921_v49 }
 0x238   : > { %3849 = vmatprep.mubr.msk.f32.mxu1 %vm1303_vm0, %v4929_v52 }
 0x23b   : > { %3850 = vmatmul.mubr.msk.f32.gmra.mrb[16].mxu1 %vm1303_vm0, %v4936_v61 }
 0x23c   : > { %3858 = vmatprep.mubr.msk.f32.mxu1 %vm1303_vm0, %v4815_v57  ;;  %v2785_v57 = vld [vmem:[%s5356_s5] sm:$0xff] }
 0x23d   : > { %3906 = vmatprep.subr.mxu0 %v2785_v57 }
 0x23e   : > { %3907 = vmatpush3.msra.mxu0 %v2785_v57 }
 0x23f   : > { %3859 = vmatmul.mubr.msk.f32.vlgmr.msra.gmra.mrb[18].mxu1 %vm1303_vm0, %v4820_v10 }
 0x240   : > { %3861 = vmatprep.mubr.msk.f32.mxu1 %vm1303_vm0, %v4952_v2 }
 0x243   : > { %3862 = vmatmul.mubr.msk.f32.gmra.mrb[20].mxu1 %vm1303_vm0, %v4957_v6 }
 0x244   : > { %3864 = vmatprep.mubr.msk.f32.mxu1 %vm1303_vm0, %v1740_v14 }
 0x247   : > { %3865 = vmatmul.mubr.msk.f32.gmra.mrb[22].mxu1 %vm1303_vm0, %v1741_v55 }
 0x248   : > { %3867 = vmatprep.mubr.msk.f32.mxu1 %vm1303_vm0, %v1742_v20 }
 0x24b   : > { %3868 = vmatmul.mubr.msk.f32.gmra.mrb[24].mxu1 %vm1303_vm0, %v1743_v24 }
 0x24c   : > { %3870 = vmatprep.mubr.msk.f32.mxu1 %vm1303_vm0, %v1744_v26 }
 0x24f   : > { %3871 = vmatmul.mubr.msk.f32.gmra.mrb[26].mxu1 %vm1303_vm0, %v1745_v27 }
 0x250   : > { %3873 = vmatprep.mubr.msk.f32.mxu1 %vm1303_vm0, %v1746_v28 }
 0x253   : > { %3874 = vmatmul.mubr.msk.f32.gmra.mrb[28].mxu1 %vm1303_vm0, %v1747_v30 }
 0x254   : > { %3876 = vmatprep.mubr.msk.f32.mxu1 %vm1303_vm0, %v4829_v5 }
 0x257   : > { %3877 = vmatmul.mubr.msk.f32.gmra.mrb[30].mxu1 %vm1303_vm0, %v4847_v45  ;;  %v2355_v45 = vld [vmem:[#allocation2 + $0x118] sm:$0xff] }
 0x258   : > { %3879 = vmatprep.mubr.msk.f32.mxu1 %vm1303_vm0, %v4849_v16  ;;  %v2356_v16 = vld [vmem:[#allocation2 + $0x120] sm:$0xff] }
 0x25b   : > { %3880 = vmatmul.mubr.msk.f32.gmra.mrb[0].mxu1 %vm1303_vm0, %v4863_v22 }
 0x25c   : > { %3882 = vmatprep.mubr.msk.f32.mxu1 %vm1303_vm0, %v4868_v25 }
 0x25f   : > { %3883 = vmatmul.mubr.msk.f32.gmra.mrb[2].mxu1 %vm1303_vm0, %v4874_v17 }
 0x260   : > { %3885 = vmatprep.mubr.msk.f32.mxu1 %vm1303_vm0, %v4881_v29 }
 0x263   : > { %3886 = vmatmul.mubr.msk.f32.gmra.mrb[4].mxu1 %vm1303_vm0, %v4886_v31 }
 0x264   : > { %3888 = vmatprep.mubr.msk.f32.mxu1 %vm1303_vm0, %v4893_v35 }
 0x267   : > { %3889 = vmatmul.mubr.msk.f32.gmra.mrb[6].mxu1 %vm1303_vm0, %v4898_v39 }
 0x268   : > { %3891 = vmatprep.mubr.msk.f32.mxu1 %vm1303_vm0, %v4905_v23 }
 0x26b   : > { %3892 = vmatmul.mubr.msk.f32.gmra.mrb[8].mxu1 %vm1303_vm0, %v4910_v44 }
 0x26c   : > { %3894 = vmatprep.mubr.msk.f32.mxu1 %vm1303_vm0, %v4916_v48 }
 0x26f   : > { %3895 = vmatmul.mubr.msk.f32.gmra.mrb[10].mxu1 %vm1303_vm0, %v4921_v49 }
 0x270   : > { %3897 = vmatprep.mubr.msk.f32.mxu1 %vm1303_vm0, %v4929_v52 }
 0x273   : > { %3898 = vmatmul.mubr.msk.f32.gmra.mrb[12].mxu1 %vm1303_vm0, %v4936_v61 }
 0x274   : > { %v3752_v10 = vpop.f32.mrb[32].mxu0  ;;  %3900 = vmatprep.mubr.msk.f32.mxu1 %vm1303_vm0, %v4938_v58 }
 0x275   : > { %v1935_v5 = vpop.f32.mrb[33].mxu0 }
 0x277   : > { %3901 = vmatmul.mubr.msk.f32.gmra.mrb[14].mxu1 %vm1303_vm0, %v4946_v62 }
 0x278   : > { %3903 = vmatprep.mubr.msk.f32.mxu1 %vm1303_vm0, %v2355_v45 }
 0x27b   : > { %3904 = vmatmul.mubr.msk.f32.gmra.mrb[16].mxu1 %vm1303_vm0, %v2356_v16 }
 0x27c   : > { %v3755_v22 = vpop.f32.mrb[34].mxu0 }
 0x27d   : > { %v1945_v25 = vpop.f32.mrb[35].mxu0 }
 0x2d2   : > { %v3758_v17 = vpop.f32.mrb[36].mxu0 }
 0x2d3   : > { %v1955_v29 = vpop.f32.mrb[37].mxu0 }
 0x2da   : > { %v3761_v31 = vpop.f32.mrb[38].mxu0 }
 0x2db   : > { %v1965_v32 = vpop.f32.mrb[39].mxu0 }
 0x2e2   : > { %v3764_v33 = vpop.f32.mrb[40].mxu0 }
 0x2e3   : > { %v1975_v34 = vpop.f32.mrb[41].mxu0 }
 0x2ea   : > { %v3767_v35 = vpop.f32.mrb[42].mxu0 }
 0x2eb   : > { %v1985_v37 = vpop.f32.mrb[43].mxu0 }
 0x2ee   : > { %v3770_v39 = vpop.f32.mrb[44].mxu0 }
 0x2ef   : > { %v1995_v41 = vpop.f32.mrb[45].mxu0 }
 0x312   : > { %v3860_v42 = vpop.f32.mrb[18].mxu1 }
 0x313   : > { %v3980_v23 = vadd.f32 %v3860_v42, %v3752_v10  ;;  %v2523_v38 = vpop.f32.mrb[19].mxu1 }
 0x314   : > { %v3981_v44 = vadd.f32 %v2523_v38, %v1935_v5 }
 0x315   : > { %v2722_v51 = vadd.f32 %v3980_v23, %v5096_v43 }
 0x316   : > { %v2721_v46 = vadd.f32 %v3981_v44, %v5096_v43  ;;  %v3863_v36 = vpop.f32.mrb[20].mxu1 }
 0x317   : > { %v3982_v48 = vadd.f32 %v3863_v36, %v3755_v22  ;;  %v2533_v40 = vpop.f32.mrb[21].mxu1  ;;  %v2754_v47 = vmax.f32 %v2722_v51, 0.0 }
 0x318   : > { %v2753_v49 = vmax.f32 %v2721_v46, 0.0  ;;  %v3983_v1 = vadd.f32 %v2533_v40, %v1945_v25 }
 0x319   : > { %v2724_v50 = vadd.f32 %v3982_v48, %v5096_v43 }
 0x31a   : > { %v2723_v52 = vadd.f32 %v3983_v1, %v5096_v43  ;;  %v3866_v54 = vpop.f32.mrb[22].mxu1  ;;  %3908 = vmatprep.mubr.msk.f32.mxu0 %vm1345_vm5, %v2753_v49 }
 0x31b   : > { %v3984_v0 = vadd.f32 %v3866_v54, %v3758_v17  ;;  %v2543_v13 = vpop.f32.mrb[23].mxu1  ;;  %3909 = vmatmul.mubr.msk.f32.vlgmr.msra.gmra.mrb[46].mxu0 %vm1345_vm5, %v2754_v47  ;;  %v2756_v59 = vmax.f32 %v2724_v50, 0.0 }
 0x31c   : > { %v2755_v61 = vmax.f32 %v2723_v52, 0.0  ;;  %v3985_v58 = vadd.f32 %v2543_v13, %v1955_v29 }
 0x31d   : > { %v2726_v60 = vadd.f32 %v3984_v0, %v5096_v43 }
 0x31e   : > { %v2725_v53 = vadd.f32 %v3985_v58, %v5096_v43  ;;  %v3869_v62 = vpop.f32.mrb[24].mxu1  ;;  %3911 = vmatprep.mubr.msk.f32.mxu0 %vm1345_vm5, %v2755_v61 }
 0x31f   : > { %v3986_v63 = vadd.f32 %v3869_v62, %v3761_v31  ;;  %v2553_v2 = vpop.f32.mrb[25].mxu1  ;;  %3912 = vmatmul.mubr.msk.f32.gmra.mrb[48].mxu0 %vm1345_vm5, %v2756_v59  ;;  %v2758_v7 = vmax.f32 %v2726_v60, 0.0 }
 0x320   : > { %v2757_v4 = vmax.f32 %v2725_v53, 0.0  ;;  %v3987_v6 = vadd.f32 %v2553_v2, %v1965_v32 }
 0x321   : > { %v2728_v8 = vadd.f32 %v3986_v63, %v5096_v43 }
 0x322   : > { %v2727_v9 = vadd.f32 %v3987_v6, %v5096_v43  ;;  %v3872_v11 = vpop.f32.mrb[26].mxu1  ;;  %3914 = vmatprep.mubr.msk.f32.mxu0 %vm1345_vm5, %v2757_v4 }
 0x323   : > { %v3988_v12 = vadd.f32 %v3872_v11, %v3764_v33  ;;  %v2563_v14 = vpop.f32.mrb[27].mxu1  ;;  %3915 = vmatmul.mubr.msk.f32.gmra.mrb[50].mxu0 %vm1345_vm5, %v2758_v7  ;;  %v2760_v56 = vmax.f32 %v2728_v8, 0.0 }
 0x324   : > { %v2759_v15 = vmax.f32 %v2727_v9, 0.0  ;;  %v3989_v55 = vadd.f32 %v2563_v14, %v1975_v34 }
 0x325   : > { %v2730_v3 = vadd.f32 %v3988_v12, %v5096_v43 }
 0x326   : > { %v2729_v19 = vadd.f32 %v3989_v55, %v5096_v43  ;;  %v3875_v20 = vpop.f32.mrb[28].mxu1  ;;  %3917 = vmatprep.mubr.msk.f32.mxu0 %vm1345_vm5, %v2759_v15 }
 0x327   : > { %v3990_v21 = vadd.f32 %v3875_v20, %v3767_v35  ;;  %v2573_v24 = vpop.f32.mrb[29].mxu1  ;;  %3918 = vmatmul.mubr.msk.f32.gmra.mrb[52].mxu0 %vm1345_vm5, %v2760_v56  ;;  %v2762_v27 = vmax.f32 %v2730_v3, 0.0 }
 0x328   : > { %v2761_v18 = vmax.f32 %v2729_v19, 0.0  ;;  %v3991_v26 = vadd.f32 %v2573_v24, %v1985_v37 }
 0x329   : > { %v2732_v28 = vadd.f32 %v3990_v21, %v5096_v43 }
 0x32a   : > { %v2731_v30 = vadd.f32 %v3991_v26, %v5096_v43  ;;  %v3878_v57 = vpop.f32.mrb[30].mxu1  ;;  %3920 = vmatprep.mubr.msk.f32.mxu0 %vm1345_vm5, %v2761_v18 }
 0x32b   : > { %v3992_v10 = vadd.f32 %v3878_v57, %v3770_v39  ;;  %v2583_v5 = vpop.f32.mrb[31].mxu1  ;;  %3921 = vmatmul.mubr.msk.f32.gmra.mrb[54].mxu0 %vm1345_vm5, %v2762_v27  ;;  %v2764_v22 = vmax.f32 %v2732_v28, 0.0 }
 0x32c   : > { %v2763_v45 = vmax.f32 %v2731_v30, 0.0  ;;  %v3993_v16 = vadd.f32 %v2583_v5, %v1995_v41 }
 0x32d   : > { %v2734_v25 = vadd.f32 %v3992_v10, %v5096_v43  ;;  %v5165_v10 = vld [vmem:[%s5357_s6] ss:$0 sm:$0xff] }
 0x32e   : > { %v2733_v17 = vadd.f32 %v3993_v16, %v5096_v43  ;;  %v3881_v29 = vpop.f32.mrb[0].mxu1  ;;  %3923 = vmatprep.mubr.msk.f32.mxu0 %vm1345_vm5, %v2763_v45 }
 0x32f   : > { %v2593_v31 = vpop.f32.mrb[1].mxu1  ;;  %3924 = vmatmul.mubr.msk.f32.gmra.mrb[56].mxu0 %vm1345_vm5, %v2764_v22  ;;  %v2766_v34 = vmax.f32 %v2734_v25, 0.0  ;;  %v2736_v35 = vadd.f32 %v3881_v29, %v5096_v43  ;;  %v4096_v22 = vld [vmem:[%s4384_s15 + $0x8] sm:$0xff] }
 0x330   : > { %v2765_v32 = vmax.f32 %v2733_v17, 0.0  ;;  %v2735_v33 = vadd.f32 %v5096_v43, %v2593_v31  ;;  %v4097_v17 = vld [vmem:[%s4384_s15] sm:$0xff] }
 0x331   : > { %v2768_v23 = vmax.f32 %v2736_v35, 0.0 }
 0x332   : > { %v2767_v37 = vmax.f32 %v2735_v33, 0.0  ;;  %v3884_v39 = vpop.f32.mrb[2].mxu1  ;;  %3926 = vmatprep.mubr.msk.f32.mxu0 %vm1345_vm5, %v2765_v32 }
 0x333   : > { %v2603_v41 = vpop.f32.mrb[3].mxu1  ;;  %3927 = vmatmul.mubr.msk.f32.gmra.mrb[58].mxu0 %vm1345_vm5, %v2766_v34  ;;  %v2738_v38 = vadd.f32 %v3884_v39, %v5096_v43  ;;  %v4098_v39 = vld [vmem:[%s4384_s15 + $0x18] sm:$0xff] }
 0x334   : > { %v2737_v42 = vadd.f32 %v5096_v43, %v2603_v41  ;;  %3929 = vmatprep.mubr.msk.f32.mxu0 %vm1345_vm5, %v2767_v37 }
 0x335   : > { %v2770_v48 = vmax.f32 %v2738_v38, 0.0 }
 0x336   : > { %v2769_v44 = vmax.f32 %v2737_v42, 0.0  ;;  %v3887_v51 = vpop.f32.mrb[4].mxu1  ;;  %v4099_v42 = vld [vmem:[%s4384_s15 + $0x10] sm:$0xff] }
 0x337   : > { %v2613_v46 = vpop.f32.mrb[5].mxu1  ;;  %3930 = vmatmul.mubr.msk.f32.gmra.mrb[60].mxu0 %vm1345_vm5, %v2768_v23  ;;  %v2740_v40 = vadd.f32 %v3887_v51, %v5096_v43 }
 0x338   : > { %v2739_v36 = vadd.f32 %v5096_v43, %v2613_v46  ;;  %3932 = vmatprep.mubr.msk.f32.mxu0 %vm1345_vm5, %v2769_v44 }
 0x339   : > { %v2772_v52 = vmax.f32 %v2740_v40, 0.0  ;;  %v4100_v40 = vld [vmem:[%s4384_s15 + $0x28] sm:$0xff] }
 0x33a   : > { %v2771_v49 = vmax.f32 %v2739_v36, 0.0  ;;  %v3890_v1 = vpop.f32.mrb[6].mxu1 }
 0x33b   : > { %v2623_v47 = vpop.f32.mrb[7].mxu1  ;;  %3933 = vmatmul.mubr.msk.f32.gmra.mrb[62].mxu0 %vm1345_vm5, %v2770_v48  ;;  %v2742_v54 = vadd.f32 %v3890_v1, %v5096_v43  ;;  %v4101_v1 = vld [vmem:[%s4384_s15 + $0x20] sm:$0xff] }
 0x33c   : > { %v2741_v50 = vadd.f32 %v5096_v43, %v2623_v47  ;;  %3935 = vmatprep.mubr.msk.f32.mxu0 %vm1345_vm5, %v2771_v49 }
 0x33d   : > { %v2774_v59 = vmax.f32 %v2742_v54, 0.0 }
 0x33e   : > { %v2773_v0 = vmax.f32 %v2741_v50, 0.0  ;;  %v3893_v13 = vpop.f32.mrb[8].mxu1 }
 0x33f   : > { %v2633_v61 = vpop.f32.mrb[9].mxu1  ;;  %3936 = vmatmul.mubr.msk.f32.gmra.mrb[64].mxu0 %vm1345_vm5, %v2772_v52  ;;  %v2744_v60 = vadd.f32 %v3893_v13, %v5096_v43 }
 0x340   : > { %v2743_v58 = vadd.f32 %v5096_v43, %v2633_v61  ;;  %3938 = vmatprep.mubr.msk.f32.mxu0 %vm1345_vm5, %v2773_v0 }
 0x341   : > { %v2776_v4 = vmax.f32 %v2744_v60, 0.0  ;;  %v4103_v60 = vld [vmem:[%s4384_s15 + $0x30] sm:$0xff] }
 0x342   : > { %v2775_v53 = vmax.f32 %v2743_v58, 0.0  ;;  %v3896_v62 = vpop.f32.mrb[10].mxu1  ;;  %v4102_v58 = vld [vmem:[%s4384_s15 + $0x38] sm:$0xff] }
 0x343   : > { %v2643_v63 = vpop.f32.mrb[11].mxu1  ;;  %3939 = vmatmul.mubr.msk.f32.gmra.mrb[66].mxu0 %vm1345_vm5, %v2774_v59  ;;  %v2746_v6 = vadd.f32 %v3896_v62, %v5096_v43 }
 0x344   : > { %v2745_v2 = vadd.f32 %v5096_v43, %v2643_v63  ;;  %3941 = vmatprep.mubr.msk.f32.mxu0 %vm1345_vm5, %v2775_v53 }
 0x345   : > { %v2778_v12 = vmax.f32 %v2746_v6, 0.0 }
 0x346   : > { %v2777_v7 = vmax.f32 %v2745_v2, 0.0  ;;  %v3899_v8 = vpop.f32.mrb[12].mxu1 }
 0x347   : > { %v2653_v9 = vpop.f32.mrb[13].mxu1  ;;  %3942 = vmatmul.mubr.msk.f32.gmra.mrb[68].mxu0 %vm1345_vm5, %v2776_v4  ;;  %v2748_v14 = vadd.f32 %v3899_v8, %v5096_v43  ;;  %v4104_v8 = vld [vmem:[%s4384_s15 + $0x48] sm:$0xff] }
 0x348   : > { %v2747_v11 = vadd.f32 %v5096_v43, %v2653_v9  ;;  %3944 = vmatprep.mubr.msk.f32.mxu0 %vm1345_vm5, %v2777_v7 }
 0x349   : > { %v2780_v19 = vmax.f32 %v2748_v14, 0.0 }
 0x34a   : > { %v2779_v15 = vmax.f32 %v2747_v11, 0.0  ;;  %v3902_v55 = vpop.f32.mrb[14].mxu1  ;;  %v4105_v11 = vld [vmem:[%s4384_s15 + $0x40] sm:$0xff] }
 0x34b   : > { %v2663_v56 = vpop.f32.mrb[15].mxu1  ;;  %3945 = vmatmul.mubr.msk.f32.gmra.mrb[70].mxu0 %vm1345_vm5, %v2778_v12  ;;  %v2750_v20 = vadd.f32 %v3902_v55, %v5096_v43 }
 0x34c   : > { %v2749_v3 = vadd.f32 %v5096_v43, %v2663_v56  ;;  %3947 = vmatprep.mubr.msk.f32.mxu0 %vm1345_vm5, %v2779_v15 }
 0x34d   : > { %v2782_v27 = vmax.f32 %v2750_v20, 0.0  ;;  %v4106_v20 = vld [vmem:[%s4384_s15 + $0x58] sm:$0xff] }
 0x34e   : > { %v2781_v21 = vmax.f32 %v2749_v3, 0.0  ;;  %v3905_v24 = vpop.f32.mrb[16].mxu1 }
 0x34f   : > { %v2673_v18 = vpop.f32.mrb[17].mxu1  ;;  %3948 = vmatmul.mubr.msk.f32.gmra.mrb[72].mxu0 %vm1345_vm5, %v2780_v19  ;;  %v2752_v28 = vadd.f32 %v3905_v24, %v5096_v43  ;;  %v4107_v24 = vld [vmem:[%s4384_s15 + $0x50] sm:$0xff] }
 0x350   : > { %v2751_v26 = vadd.f32 %v5096_v43, %v2673_v18  ;;  %3950 = vmatprep.mubr.msk.f32.mxu0 %vm1345_vm5, %v2781_v21 }
 0x351   : > { %v2784_v57 = vmax.f32 %v2752_v28, 0.0 }
 0x352   : > { %v2783_v30 = vmax.f32 %v2751_v26, 0.0 }
 0x353   : > { %3951 = vmatmul.mubr.msk.f32.gmra.mrb[74].mxu0 %vm1345_vm5, %v2782_v27 }
 0x354   : > { %3953 = vmatprep.mubr.msk.f32.mxu0 %vm1345_vm5, %v2783_v30 }
 0x357   : > { %3954 = vmatmul.mubr.msk.f32.gmra.mrb[76].mxu0 %vm1345_vm5, %v2784_v57 }
 0x3ee   : > { %v3910_v5 = vpop.f32.mrb[46].mxu0 }
 0x3ef   : > { %v2961_v45 = vadd.f32 %v3910_v5, %v5165_v10  ;;  %v2955_v16 = vpop.f32.mrb[47].mxu0 }
 0x3f0   : > { %v2956_v43 = vadd.f32 %v5165_v10, %v2955_v16 }
 0x3f1   : > { %v3115_v25 = vadd.f32 %v4096_v22, %v2961_v45  ;;  %v4108_v45 = vld [vmem:[%s4384_s15 + $0x68] sm:$0xff] }
 0x3f2   : > { %v3114_v29 = vadd.f32 %v4097_v17, %v2956_v43  ;;  %v3913_v31 = vpop.f32.mrb[48].mxu0  ;;  %v4109_v43 = vld [vmem:[%s4384_s15 + $0x60] sm:$0xff] }
 0x3f3   : > { %v3147_v32 = vmax.f32 %v3115_v25, 0.0  ;;  %v2971_v33 = vadd.f32 %v3913_v31, %v5165_v10  ;;  %v2965_v34 = vpop.f32.mrb[49].mxu0 }
 0x3f4   : > { %v3146_v35 = vmax.f32 %v3114_v29, 0.0  ;;  %v2966_v37 = vadd.f32 %v5165_v10, %v2965_v34  ;;  %v4110_v34 = vld [vmem:[%s4384_s15 + $0x78] sm:$0xff] }
 0x3f5   : > { %3179 = vst.msk [vmem:[%s5175_s19 + $0x8] sm:$0xff] %vm340_vm1, %v3147_v32  ;;  %v3117_v41 = vadd.f32 %v4098_v39, %v2971_v33 }
 0x3f6   : > { %3178 = vst.msk [vmem:[%s5175_s19] sm:$0xff] %vm340_vm1, %v3146_v35  ;;  %v3116_v23 = vadd.f32 %v4099_v42, %v2966_v37  ;;  %v3916_v38 = vpop.f32.mrb[50].mxu0  ;;  %v4111_v37 = vld [vmem:[%s4384_s15 + $0x70] sm:$0xff] }
 0x3f7   : > { %v3149_v44 = vmax.f32 %v3117_v41, 0.0  ;;  %v2981_v51 = vadd.f32 %v3916_v38, %v5165_v10  ;;  %v2975_v46 = vpop.f32.mrb[51].mxu0 }
 0x3f8   : > { %v3148_v36 = vmax.f32 %v3116_v23, 0.0  ;;  %v2976_v48 = vadd.f32 %v5165_v10, %v2975_v46  ;;  %v4112_v46 = vld [vmem:[%s4384_s15 + $0x88] sm:$0xff] }
 0x3f9   : > { %3181 = vst.msk [vmem:[%s5175_s19 + $0x18] sm:$0xff] %vm340_vm1, %v3149_v44  ;;  %v3119_v49 = vadd.f32 %v4100_v40, %v2981_v51 }
 0x3fa   : > { %3180 = vst.msk [vmem:[%s5175_s19 + $0x10] sm:$0xff] %vm340_vm1, %v3148_v36  ;;  %v3118_v47 = vadd.f32 %v4101_v1, %v2976_v48  ;;  %v3919_v50 = vpop.f32.mrb[52].mxu0  ;;  %v4113_v48 = vld [vmem:[%s4384_s15 + $0x80] sm:$0xff] }
 0x3fb   : > { %v3151_v52 = vmax.f32 %v3119_v49, 0.0  ;;  %v2991_v54 = vadd.f32 %v3919_v50, %v5165_v10  ;;  %v2985_v0 = vpop.f32.mrb[53].mxu0 }
 0x3fc   : > { %v3150_v13 = vmax.f32 %v3118_v47, 0.0  ;;  %v2986_v61 = vadd.f32 %v5165_v10, %v2985_v0  ;;  %v4114_v0 = vld [vmem:[%s4384_s15 + $0x98] sm:$0xff] }
 0x3fd   : > { %3183 = vst.msk [vmem:[%s5175_s19 + $0x28] sm:$0xff] %vm340_vm1, %v3151_v52  ;;  %v3121_v59 = vadd.f32 %v4102_v58, %v2991_v54 }
 0x3fe   : > { %3182 = vst.msk [vmem:[%s5175_s19 + $0x20] sm:$0xff] %vm340_vm1, %v3150_v13  ;;  %v3120_v53 = vadd.f32 %v4103_v60, %v2986_v61  ;;  %v3922_v62 = vpop.f32.mrb[54].mxu0  ;;  %v4115_v61 = vld [vmem:[%s4384_s15 + $0x90] sm:$0xff] }
 0x3ff   : > { %v3153_v63 = vmax.f32 %v3121_v59, 0.0  ;;  %v3001_v2 = vadd.f32 %v3922_v62, %v5165_v10  ;;  %v2995_v4 = vpop.f32.mrb[55].mxu0 }
 0x400   : > { %v3152_v6 = vmax.f32 %v3120_v53, 0.0  ;;  %v2996_v7 = vadd.f32 %v5165_v10, %v2995_v4  ;;  %v4116_v4 = vld [vmem:[%s4384_s15 + $0xa8] sm:$0xff] }
 0x401   : > { %3185 = vst.msk [vmem:[%s5175_s19 + $0x38] sm:$0xff] %vm340_vm1, %v3153_v63  ;;  %v3123_v9 = vadd.f32 %v4104_v8, %v3001_v2 }
 0x402   : > { %3184 = vst.msk [vmem:[%s5175_s19 + $0x30] sm:$0xff] %vm340_vm1, %v3152_v6  ;;  %v3122_v12 = vadd.f32 %v4105_v11, %v2996_v7  ;;  %v3925_v14 = vpop.f32.mrb[56].mxu0  ;;  %v4117_v7 = vld [vmem:[%s4384_s15 + $0xa0] sm:$0xff] }
 0x403   : > { %v3155_v15 = vmax.f32 %v3123_v9, 0.0  ;;  %v3011_v55 = vadd.f32 %v3925_v14, %v5165_v10  ;;  %v3005_v56 = vpop.f32.mrb[57].mxu0 }
 0x404   : > { %v3154_v3 = vmax.f32 %v3122_v12, 0.0  ;;  %v3006_v19 = vadd.f32 %v5165_v10, %v3005_v56  ;;  %v4118_v56 = vld [vmem:[%s4384_s15 + $0xb8] sm:$0xff] }
 0x405   : > { %3187 = vst.msk [vmem:[%s5175_s19 + $0x48] sm:$0xff] %vm340_vm1, %v3155_v15  ;;  %v3125_v21 = vadd.f32 %v4106_v20, %v3011_v55 }
 0x406   : > { %3186 = vst.msk [vmem:[%s5175_s19 + $0x40] sm:$0xff] %vm340_vm1, %v3154_v3  ;;  %v3124_v18 = vadd.f32 %v4107_v24, %v3006_v19  ;;  %v3928_v26 = vpop.f32.mrb[58].mxu0  ;;  %v4119_v19 = vld [vmem:[%s4384_s15 + $0xb0] sm:$0xff] }
 0x407   : > { %v3157_v27 = vmax.f32 %v3125_v21, 0.0  ;;  %v3021_v28 = vadd.f32 %v3928_v26, %v5165_v10  ;;  %v3015_v30 = vpop.f32.mrb[59].mxu0 }
 0x408   : > { %v3156_v57 = vmax.f32 %v3124_v18, 0.0  ;;  %v3016_v5 = vadd.f32 %v5165_v10, %v3015_v30  ;;  %v4120_v30 = vld [vmem:[%s4384_s15 + $0xc8] sm:$0xff] }
 0x409   : > { %3189 = vst.msk [vmem:[%s5175_s19 + $0x58] sm:$0xff] %vm340_vm1, %v3157_v27  ;;  %v3127_v16 = vadd.f32 %v4108_v45, %v3021_v28 }
 0x40a   : > { %3188 = vst.msk [vmem:[%s5175_s19 + $0x50] sm:$0xff] %vm340_vm1, %v3156_v57  ;;  %v3126_v22 = vadd.f32 %v4109_v43, %v3016_v5  ;;  %v3931_v25 = vpop.f32.mrb[60].mxu0  ;;  %v4121_v5 = vld [vmem:[%s4384_s15 + $0xc0] sm:$0xff] }
 0x40b   : > { %v3159_v17 = vmax.f32 %v3127_v16, 0.0  ;;  %v3031_v29 = vadd.f32 %v3931_v25, %v5165_v10  ;;  %v3025_v31 = vpop.f32.mrb[61].mxu0 }
 0x40c   : > { %v3158_v32 = vmax.f32 %v3126_v22, 0.0  ;;  %v3026_v33 = vadd.f32 %v5165_v10, %v3025_v31  ;;  %v4122_v31 = vld [vmem:[%s4384_s15 + $0xd8] sm:$0xff] }
 0x40d   : > { %3191 = vst.msk [vmem:[%s5175_s19 + $0x68] sm:$0xff] %vm340_vm1, %v3159_v17  ;;  %v3129_v35 = vadd.f32 %v4110_v34, %v3031_v29 }
 0x40e   : > { %3190 = vst.msk [vmem:[%s5175_s19 + $0x60] sm:$0xff] %vm340_vm1, %v3158_v32  ;;  %v3128_v39 = vadd.f32 %v4111_v37, %v3026_v33  ;;  %v3934_v41 = vpop.f32.mrb[62].mxu0  ;;  %v4123_v33 = vld [vmem:[%s4384_s15 + $0xd0] sm:$0xff] }
 0x40f   : > { %v3161_v42 = vmax.f32 %v3129_v35, 0.0  ;;  %v3041_v23 = vadd.f32 %v3934_v41, %v5165_v10  ;;  %v3035_v38 = vpop.f32.mrb[63].mxu0 }
 0x410   : > { %v3160_v44 = vmax.f32 %v3128_v39, 0.0  ;;  %v3036_v51 = vadd.f32 %v5165_v10, %v3035_v38  ;;  %v4124_v38 = vld [vmem:[%s4384_s15 + $0xe8] sm:$0xff] }
 0x411   : > { %3193 = vst.msk [vmem:[%s5175_s19 + $0x78] sm:$0xff] %vm340_vm1, %v3161_v42  ;;  %v3131_v36 = vadd.f32 %v4112_v46, %v3041_v23 }
 0x412   : > { %3192 = vst.msk [vmem:[%s5175_s19 + $0x70] sm:$0xff] %vm340_vm1, %v3160_v44  ;;  %v3130_v40 = vadd.f32 %v4113_v48, %v3036_v51  ;;  %v3937_v49 = vpop.f32.mrb[64].mxu0  ;;  %v4125_v51 = vld [vmem:[%s4384_s15 + $0xe0] sm:$0xff] }
 0x413   : > { %v3163_v1 = vmax.f32 %v3131_v36, 0.0  ;;  %v3051_v47 = vadd.f32 %v3937_v49, %v5165_v10  ;;  %v3045_v50 = vpop.f32.mrb[65].mxu0 }
 0x414   : > { %v3162_v52 = vmax.f32 %v3130_v40, 0.0  ;;  %v3046_v54 = vadd.f32 %v5165_v10, %v3045_v50  ;;  %v4126_v50 = vld [vmem:[%s4384_s15 + $0xf8] sm:$0xff] }
 0x415   : > { %3195 = vst.msk [vmem:[%s5175_s19 + $0x88] sm:$0xff] %vm340_vm1, %v3163_v1  ;;  %v3133_v13 = vadd.f32 %v4114_v0, %v3051_v47 }
 0x416   : > { %3194 = vst.msk [vmem:[%s5175_s19 + $0x80] sm:$0xff] %vm340_vm1, %v3162_v52  ;;  %v3132_v58 = vadd.f32 %v4115_v61, %v3046_v54  ;;  %v3940_v59 = vpop.f32.mrb[66].mxu0  ;;  %v4127_v54 = vld [vmem:[%s4384_s15 + $0xf0] sm:$0xff]  ;;  %s4232_s15 = smov [#allocation6]  }
 0x417   : > { %v3165_v60 = vmax.f32 %v3133_v13, 0.0  ;;  %v3061_v53 = vadd.f32 %v3940_v59, %v5165_v10  ;;  %v3055_v62 = vpop.f32.mrb[67].mxu0  ;;  %s4162_s12 = sshll.u32 %s4232_s15, 4  ;;  %s4163_s12 = int_to_ptr.vmem [resolvable:$false] %s4162_s12 }
 0x418   : > { %v3164_v63 = vmax.f32 %v3132_v58, 0.0  ;;  %v3056_v2 = vadd.f32 %v5165_v10, %v3055_v62  ;;  %s4164_s20 = scalar_lea.vmem %s4163_s12, 8192  ;;  %p4165_p8 = scmp.lt.s32.totalorder %s5302_s21, %s4163_s12 }
 0x419   : > { %3197 = vst.msk [vmem:[%s5175_s19 + $0x98] sm:$0xff] %vm340_vm1, %v3165_v60  ;;  %v3135_v6 = vadd.f32 %v4116_v4, %v3061_v53  ;;  %p4166_p10 = scmp.lt.s32.totalorder %s4164_s20, %s4158_s18 }
 0x41a   : > { %3196 = vst.msk [vmem:[%s5175_s19 + $0x90] sm:$0xff] %vm340_vm1, %v3164_v63  ;;  %v3134_v8 = vadd.f32 %v4117_v7, %v3056_v2  ;;  %v3943_v9 = vpop.f32.mrb[68].mxu0 }
 0x41b   : > { %v3167_v11 = vmax.f32 %v3135_v6, 0.0  ;;  %v3071_v12 = vadd.f32 %v3943_v9, %v5165_v10  ;;  %v3065_v14 = vpop.f32.mrb[69].mxu0  ;;  %p4167_p0 = por %p4166_p10, %p4165_p8 }
 0x41c   : > { %v3166_v15 = vmax.f32 %v3134_v8, 0.0  ;;  %v3066_v55 = vadd.f32 %v5165_v10, %v3065_v14 }
 0x41d   : > { %3199 = vst.msk [vmem:[%s5175_s19 + $0xa8] sm:$0xff] %vm340_vm1, %v3167_v11  ;;  %v3137_v3 = vadd.f32 %v4118_v56, %v3071_v12  ;;  %p4168_p2 = pnand %p4167_p0, %p4161_p13 }
 0x41e   : > { %3198 = vst.msk [vmem:[%s5175_s19 + $0xa0] sm:$0xff] %vm340_vm1, %v3166_v15  ;;  %v3136_v20 = vadd.f32 %v4119_v19, %v3066_v55  ;;  %v3946_v21 = vpop.f32.mrb[70].mxu0 }
 0x41f   : > { %v3169_v24 = vmax.f32 %v3137_v3, 0.0  ;;  %v3081_v18 = vadd.f32 %v3946_v21, %v5165_v10  ;;  %v3075_v26 = vpop.f32.mrb[71].mxu0 }
 0x420   : > { %v3168_v27 = vmax.f32 %v3136_v20, 0.0  ;;  %v3076_v28 = vadd.f32 %v5165_v10, %v3075_v26 }
 0x421   : > { %3201 = vst.msk [vmem:[%s5175_s19 + $0xb8] sm:$0xff] %vm340_vm1, %v3169_v24  ;;  %v3139_v57 = vadd.f32 %v4120_v30, %v3081_v18 }
 0x422   : > { %3200 = vst.msk [vmem:[%s5175_s19 + $0xb0] sm:$0xff] %vm340_vm1, %v3168_v27  ;;  %v3138_v45 = vadd.f32 %v4121_v5, %v3076_v28  ;;  %v3949_v16 = vpop.f32.mrb[72].mxu0 }
 0x423   : > { %v3171_v43 = vmax.f32 %v3139_v57, 0.0  ;;  %v3091_v22 = vadd.f32 %v3949_v16, %v5165_v10  ;;  %v3085_v25 = vpop.f32.mrb[73].mxu0 }
 0x424   : > { %v3170_v17 = vmax.f32 %v3138_v45, 0.0  ;;  %v3086_v29 = vadd.f32 %v5165_v10, %v3085_v25 }
 0x425   : > { %3203 = vst.msk [vmem:[%s5175_s19 + $0xc8] sm:$0xff] %vm340_vm1, %v3171_v43  ;;  %v3141_v32 = vadd.f32 %v4122_v31, %v3091_v22 }
 0x426   : > { %3202 = vst.msk [vmem:[%s5175_s19 + $0xc0] sm:$0xff] %vm340_vm1, %v3170_v17  ;;  %v3140_v34 = vadd.f32 %v4123_v33, %v3086_v29  ;;  %v3952_v35 = vpop.f32.mrb[74].mxu0 }
 0x427   : > { %v3173_v37 = vmax.f32 %v3141_v32, 0.0  ;;  %v3101_v39 = vadd.f32 %v3952_v35, %v5165_v10  ;;  %v3095_v41 = vpop.f32.mrb[75].mxu0 }
 0x428   : > { %v3172_v42 = vmax.f32 %v3140_v34, 0.0  ;;  %v3096_v23 = vadd.f32 %v5165_v10, %v3095_v41 }
 0x429   : > { %3205 = vst.msk [vmem:[%s5175_s19 + $0xd8] sm:$0xff] %vm340_vm1, %v3173_v37  ;;  %v3143_v44 = vadd.f32 %v4124_v38, %v3101_v39 }
 0x42a   : > { %3204 = vst.msk [vmem:[%s5175_s19 + $0xd0] sm:$0xff] %vm340_vm1, %v3172_v42  ;;  %v3142_v46 = vadd.f32 %v4125_v51, %v3096_v23  ;;  %v3955_v36 = vpop.f32.mrb[76].mxu0 }
 0x42b   : > { %v3175_v48 = vmax.f32 %v3143_v44, 0.0  ;;  %v3111_v40 = vadd.f32 %v3955_v36, %v5165_v10  ;;  %v3105_v49 = vpop.f32.mrb[77].mxu0 }
 0x42c   : > { %v3174_v1 = vmax.f32 %v3142_v46, 0.0  ;;  %v3106_v47 = vadd.f32 %v5165_v10, %v3105_v49 }
 0x42d   : > { %3207 = vst.msk [vmem:[%s5175_s19 + $0xe8] sm:$0xff] %vm340_vm1, %v3175_v48  ;;  %v3145_v52 = vadd.f32 %v4126_v50, %v3111_v40 }
 0x42e   : > { %3206 = vst.msk [vmem:[%s5175_s19 + $0xe0] sm:$0xff] %vm340_vm1, %v3174_v1  ;;  %v3144_v0 = vadd.f32 %v4127_v54, %v3106_v47 }
 0x42f   : > { %v3177_v13 = vmax.f32 %v3145_v52, 0.0 }
 0x430   : > { %v3176_v61 = vmax.f32 %v3144_v0, 0.0 }
 0x431   : > { %3209 = vst.msk [vmem:[%s5175_s19 + $0xf8] sm:$0xff] %vm340_vm1, %v3177_v13 }
 0x432   : > { %3208 = vst.msk [vmem:[%s5175_s19 + $0xf0] sm:$0xff] %vm340_vm1, %v3176_v61 }
 0x433   : > { %4171 = shalt.err (!%p4168_p2)
}
 0x434   : > { %s4172_s22 = scalar_lea.hbm %s5300_s11, 4096  ;;  %s4176_s17 = scalar_lea.hbm %s5358_s7, 8192 }
 0x435   : > { %p4173_p4 = scmp.ne.s32.totalorder %s5300_s11, %s4172_s22  ;;  %p4177_p9 = scmp.lt.u32.totalorder %s5300_s11, %s5358_s7 }
 0x436   : > { %p4178_p1 = scmp.lt.u32.totalorder %s4176_s17, %s4172_s22  ;;  %p4180_p6 = scmp.lt.u32.totalorder %s4172_s22, %s5300_s11 }
 0x437   : > { %p4174_p5 = pnand %p4173_p4, %p5371_p11 }
 0x438   : > { %p4179_p3 = por %p4178_p1, %p4177_p9 }
 0x439   : > { %p4175_p7 = pneg %p4174_p5 }
 0x43a   : > { %p4181_p12 = por %p4180_p6, %p4179_p3 }
 0x43c   : > { %p4182_p13 = pnand %p4181_p12, %p4175_p7 }
 0x43e   : > { %4185 = shalt.err (!%p4182_p13)
}
 0x43f   : > { %s4233_s18 = smov 128  }
 0x440   : > { %4046 = dma.vmem_to_hbm [thread:$0]  (%p5371_p11), %s5302_s21, 4096, %s5300_s11, %s3211_s28, %s4233_s18, %s4233_s18, %s4230_s23  }
 0x441 PF: > { %s3239_s15 = sand.u32 1, %s4212_s24   ;;  %p5372_p8 = scmp.ne.s32.totalorder %s5363_s14, 0 }
 0x442   : > { %p5373_p10 = scmp.ge.s32.totalorder %s4224_s27, 2  ;;  %s3240_s12 = scalar_lea.sflag [#allocation5], %s3239_s15 }
 0x444   : > { %p4053_p0 = pnand %p5373_p10, %p5372_p8 }
 0x446   : > { %4207 = dma.done.wait (!%p4053_p0), %s3240_s12, 4096  }
 0x447   : > { %4209 = vsyncadd (!%p4053_p0), %s3240_s12, 4294963200  ;;  %p20_p2 = scmp.ge.s32.totalorder %s4299_s30, 4   ;;  %s5374_s24 = smov %s4216_s25 }
 0x448   : > { %s5375_s25 = smov %s4220_s26  ;;  %s5376_s26 = smov %s4311_s10 }
 0x449   : > { %s5377_s27 = smov %s4299_s30  ;;  %22 = sbr.rel (!%p20_p2) target bundleno = 5 (0x5), region = 95 }
 0x450   :  { %3245 = vsyncpa [#allocation4], 1 }
 0x451   :  { %3247 = vsyncpa [#allocation4 + $0x1], 1 }
 0x452   :  { %3248 = vsyncpa [#allocation5], 1 }
 0x453   :  { %3250 = vsyncpa [#allocation5 + $0x1], 1 }

</bundles_post_ra>
